<compile_context>
chip_gen: v6e
topology: v6e:2x2x1
jax: 0.10.0
libtpu: 0.0.40
codegen_flags: <defaults>
</compile_context>

<pallas_src>
import math

import jax
import jax.numpy as jnp
from jax.experimental import pallas as pl
from jax.experimental.pallas import tpu as pltpu

NEG_SLOPE = 0.2
H1, H2 = 512, 256
N_PAD = 128                      # lane-dense padding of the 1-wide final output
VMEM_BUDGET = 24 << 20           # conservative vs. v7x's 32 MiB default scoped VMEM


def _round_up(x, m):
    return ((x + m - 1) // m) * m


def _vmem_plan_bytes(tm, d):
    """Rough per-core VMEM footprint of the pipelined plan (weights double-buffered)."""
    w_resident = 2 * (d * H1 * 2 + H1 * H2 * 2 + H2 * N_PAD * 2)   # bf16 weights, 2 bufs each
    b_resident = 2 * (H1 + H2 + N_PAD) * 4                          # f32 biases, 2 bufs each
    x_tiles = 2 * tm * d * 4                                        # f32 x tile, double-buffered
    x_cast = tm * d * 2                                             # in-kernel bf16 copy of x
    acts = tm * (H1 + H2) * (4 + 2)                                 # f32 h1/h2 + bf16 casts
    out_tiles = 2 * tm * N_PAD * 2                                  # bf16 out tile, double-buffered
    return w_resident + b_resident + x_tiles + x_cast + acts + out_tiles


def _choose_tm(b_rows, d):
    """Batch tile: >= 2 grid steps for large batches; no 256-padding of tiny ones."""
    if b_rows >= 2048:
        tm = 512
    elif b_rows >= 512:
        tm = 256                  # grid >= 2: pipelining + v7x two-TensorCore batch sharding
    else:
        tm = b_rows               # single latency-bound tile (already a multiple of 8)
    # Shrink TM until the tile plan fits the VMEM budget (guards against large D).
    while tm > 8 and _vmem_plan_bytes(tm, d) > VMEM_BUDGET:
        tm = max(8, _round_up(tm // 2, 8))
    return tm


def _discriminator_kernel(x_ref, w1_ref, b1_ref, w2_ref, b2_ref, w3_ref, b3_ref, o_ref):
    # x_ref: [TM, D] f32 (cast to bf16 here, right before the MXU); weights bf16;
    # biases f32; o_ref: [TM, 128] bf16 (column 0 is the real output).
    x = x_ref[...].astype(jnp.bfloat16)

    h1 = jnp.dot(x, w1_ref[...], preferred_element_type=jnp.float32) + b1_ref[...]
    h1 = jnp.where(h1 > 0, h1, NEG_SLOPE * h1)                        # LeakyReLU(0.2), f32

    h2 = jnp.dot(h1.astype(jnp.bfloat16), w2_ref[...],
                 preferred_element_type=jnp.float32) + b2_ref[...]
    h2 = jnp.where(h2 > 0, h2, NEG_SLOPE * h2)                        # LeakyReLU(0.2), f32

    h3 = jnp.dot(h2.astype(jnp.bfloat16), w3_ref[...],
                 preferred_element_type=jnp.float32) + b3_ref[...]
    o_ref[...] = jax.nn.sigmoid(h3).astype(o_ref.dtype)               # [TM, 128] bf16


def discriminator_forward(img, params):
    """img: [B, C, H, W] float32 (NCHW). Returns validity [B, 1] float32."""
    B = img.shape[0]
    D = math.prod(img.shape[1:])
    x_flat = img.reshape(B, D).astype(jnp.float32)    # matches torch img.view(B, -1); free

    w1, b1, w2, b2, w3, b3 = params                   # f32, weights stored [in, out]

    # Pad the batch only up to a sublane multiple (a no-op for typical batches).
    # x is streamed as f32 and cast to bf16 on-chip, so there is no bf16 HBM copy.
    B_rows = max(_round_up(B, 8), 8)
    if B_rows != B:
        x_flat = jnp.pad(x_flat, ((0, B_rows - B), (0, 0)))

    TM = _choose_tm(B_rows, D)
    num_tiles = pl.cdiv(B_rows, TM)   # last tile may be ragged; its extra writes are masked

    # Small wrapper-side casts/pads for the weights only (x stays f32).
    w1_bf = w1.astype(jnp.bfloat16)
    w2_bf = w2.astype(jnp.bfloat16)
    # Zero-pad the final layer to 128 output lanes (column 0 is the real output;
    # columns 1..127 come out as sigmoid(0)=0.5 and are sliced off below).
    w3_bf = jnp.zeros((H2, N_PAD), jnp.bfloat16).at[:, :1].set(w3.astype(jnp.bfloat16))
    b3_f = jnp.zeros((1, N_PAD), jnp.float32).at[:, :1].set(b3)
    b1_f = b1.astype(jnp.float32)
    b2_f = b2.astype(jnp.float32)

    flops = 2 * B_rows * (D * H1 + H1 * H2 + H2 * N_PAD)
    bytes_accessed = (B_rows * D * 4                                   # x read (f32)
                      + (w1_bf.size + w2_bf.size + w3_bf.size) * 2     # bf16 weights
                      + (b1_f.size + b2_f.size + b3_f.size) * 4        # f32 biases
                      + B_rows * N_PAD * 2)                            # bf16 output write

    vmem_limit = int(min(max(_vmem_plan_bytes(TM, D) * 5 // 4, 16 << 20), 64 << 20))

    out = pl.pallas_call(
        _discriminator_kernel,
        out_shape=jax.ShapeDtypeStruct((B_rows, N_PAD), jnp.bfloat16),
        grid_spec=pltpu.PrefetchScalarGridSpec(
            num_scalar_prefetch=0,
            grid=(num_tiles,),
            in_specs=[
                pl.BlockSpec((TM, D), lambda i: (i, 0)),       # x: streamed f32 per batch tile
                pl.BlockSpec((D, H1), lambda i: (0, 0)),       # w1: VMEM-resident (loaded once)
                pl.BlockSpec((1, H1), lambda i: (0, 0)),       # b1
                pl.BlockSpec((H1, H2), lambda i: (0, 0)),      # w2
                pl.BlockSpec((1, H2), lambda i: (0, 0)),       # b2
                pl.BlockSpec((H2, N_PAD), lambda i: (0, 0)),   # w3 (padded to 128 lanes)
                pl.BlockSpec((1, N_PAD), lambda i: (0, 0)),    # b3 (padded to 128 lanes)
            ],
            out_specs=pl.BlockSpec((TM, N_PAD), lambda i: (i, 0)),
        ),
        compiler_params=pltpu.CompilerParams(
            dimension_semantics=("parallel",),                 # batch tiles shard across v7x TCs
            vmem_limit_bytes=vmem_limit,
        ),
        cost_estimate=pl.CostEstimate(
            flops=int(flops),
            transcendentals=int(2 * B_rows * N_PAD),           # sigmoid ~ exp + reciprocal
            bytes_accessed=int(bytes_accessed),
        ),
    )(x_flat, w1_bf, b1_f, w2_bf, b2_f, w3_bf, b3_f)

    # Padded rows / columns 1..127 hold garbage / sigmoid(0)=0.5; sliced off here.
    return out[:B, :1].astype(jnp.float32)


def init_params(key, in_features):
    """Deterministic init mimicking torch.nn.Linear default (U[-1/sqrt(fan_in), 1/sqrt(fan_in)]).
    Weights are stored as [in, out] (transposed vs. torch's [out, in])."""
    dims = [(in_features, H1), (H1, H2), (H2, 1)]
    params = []
    for (fan_in, fan_out) in dims:
        key, kw, kb = jax.random.split(key, 3)
        bound = 1.0 / jnp.sqrt(float(fan_in))
        w = jax.random.uniform(kw, (fan_in, fan_out), jnp.float32, -bound, bound)
        b = jax.random.uniform(kb, (1, fan_out), jnp.float32, -bound, bound)
        params.extend([w, b])
    return tuple(params)


def reference_forward(img, params):
    """Pure-JAX f32 reference (matches the torch module's semantics)."""
    B = img.shape[0]
    x = img.reshape(B, -1).astype(jnp.float32)
    w1, b1, w2, b2, w3, b3 = params
    h = x @ w1 + b1
    h = jnp.where(h > 0, h, NEG_SLOPE * h)
    h = h @ w2 + b2
    h = jnp.where(h > 0, h, NEG_SLOPE * h)
    h = h @ w3 + b3
    return jax.nn.sigmoid(h)


if __name__ == "__main__":
    key = jax.random.PRNGKey(0)
    k_img, k_par = jax.random.split(key)

    # img_shape = (4, 16, 16) -> 1024 input features; batch = 2
    B, C, H, W = 2, 4, 16, 16
    img = jax.random.normal(k_img, (B, C, H, W), jnp.float32)
    params = init_params(k_par, C * H * W)

    out = discriminator_forward(img, params)
    out = jax.block_until_ready(out)

    ref = reference_forward(img, params)
    assert out.shape == (B, 1)
    # bf16 matmul inputs + bf16 output vs the f32 reference -> loosened tolerance.
    assert jnp.allclose(out, ref, atol=3e-2, rtol=3e-2), float(jnp.max(jnp.abs(out - ref)))

    print("KERNEL_OK")
</pallas_src>

<mosaic_0001>
module attributes {stable_mosaic.version = 11 : i64} {
  func.func @_discriminator_kernel(%arg0: i32, %arg1: memref<8x1024xf32, #tpu.memory_space<vmem>>, %arg2: memref<1024x512xbf16, #tpu.memory_space<vmem>>, %arg3: memref<1x512xf32, #tpu.memory_space<vmem>>, %arg4: memref<512x256xbf16, #tpu.memory_space<vmem>>, %arg5: memref<1x256xf32, #tpu.memory_space<vmem>>, %arg6: memref<256x128xbf16, #tpu.memory_space<vmem>>, %arg7: memref<1x128xf32, #tpu.memory_space<vmem>>, %arg8: memref<8x128xbf16, #tpu.memory_space<vmem>>) attributes {dimension_semantics = [#tpu.dimension_semantics<parallel>], iteration_bounds = array<i64: 1>, scalar_prefetch = 0 : i64, scratch_operands = 0 : i64, tpu.core_type = #tpu.core_type<tc>, window_params = [{transform_indices = @transform_0, window_bounds = array<i64: 8, 1024>}, {pipeline_mode = #tpu.pipeline_mode<synchronous>, transform_indices = @transform_1, window_bounds = array<i64: 1024, 512>}, {pipeline_mode = #tpu.pipeline_mode<synchronous>, transform_indices = @transform_2, window_bounds = array<i64: 1, 512>}, {pipeline_mode = #tpu.pipeline_mode<synchronous>, transform_indices = @transform_3, window_bounds = array<i64: 512, 256>}, {pipeline_mode = #tpu.pipeline_mode<synchronous>, transform_indices = @transform_4, window_bounds = array<i64: 1, 256>}, {pipeline_mode = #tpu.pipeline_mode<synchronous>, transform_indices = @transform_5, window_bounds = array<i64: 256, 128>}, {pipeline_mode = #tpu.pipeline_mode<synchronous>, transform_indices = @transform_6, window_bounds = array<i64: 1, 128>}, {transform_indices = @transform_7, window_bounds = array<i64: 8, 128>}]} {
    %c0 = arith.constant 0 : index
    %c0_0 = arith.constant 0 : index
    %0 = vector.load %arg1[%c0, %c0_0] : memref<8x1024xf32, #tpu.memory_space<vmem>>, vector<8x1024xf32>
    %1 = arith.truncf %0 : vector<8x1024xf32> to vector<8x1024xbf16>
    %c0_1 = arith.constant 0 : index
    %c0_2 = arith.constant 0 : index
    %2 = vector.load %arg2[%c0_1, %c0_2] : memref<1024x512xbf16, #tpu.memory_space<vmem>>, vector<1024x512xbf16>
    %cst = arith.constant dense<0.000000e+00> : vector<8x512xf32>
    %3 = tpu.matmul %1, %2, %cst {dimension_numbers = #tpu.dot_dimension_numbers<[1], [0], [0], [1], [0, 0, 1, 1], [], []>} : vector<8x1024xbf16>, vector<1024x512xbf16>, vector<8x512xf32> -> vector<8x512xf32>
    %c0_3 = arith.constant 0 : index
    %c0_4 = arith.constant 0 : index
    %4 = vector.load %arg3[%c0_3, %c0_4] : memref<1x512xf32, #tpu.memory_space<vmem>>, vector<1x512xf32>
    %5 = vector.broadcast %4 : vector<1x512xf32> to vector<8x512xf32>
    %6 = arith.addf %3, %5 : vector<8x512xf32>
    %cst_5 = arith.constant 0.000000e+00 : f32
    %7 = vector.broadcast %cst_5 : f32 to vector<8x512xf32>
    %8 = arith.cmpf ogt, %6, %7 : vector<8x512xf32>
    %cst_6 = arith.constant 2.000000e-01 : f32
    %9 = vector.broadcast %cst_6 : f32 to vector<8x512xf32>
    %10 = arith.mulf %9, %6 : vector<8x512xf32>
    %11 = arith.select %8, %6, %10 : vector<8x512xi1>, vector<8x512xf32>
    %12 = arith.truncf %11 : vector<8x512xf32> to vector<8x512xbf16>
    %c0_7 = arith.constant 0 : index
    %c0_8 = arith.constant 0 : index
    %13 = vector.load %arg4[%c0_7, %c0_8] : memref<512x256xbf16, #tpu.memory_space<vmem>>, vector<512x256xbf16>
    %cst_9 = arith.constant dense<0.000000e+00> : vector<8x256xf32>
    %14 = tpu.matmul %12, %13, %cst_9 {dimension_numbers = #tpu.dot_dimension_numbers<[1], [0], [0], [1], [0, 0, 1, 1], [], []>} : vector<8x512xbf16>, vector<512x256xbf16>, vector<8x256xf32> -> vector<8x256xf32>
    %c0_10 = arith.constant 0 : index
    %c0_11 = arith.constant 0 : index
    %15 = vector.load %arg5[%c0_10, %c0_11] : memref<1x256xf32, #tpu.memory_space<vmem>>, vector<1x256xf32>
    %16 = vector.broadcast %15 : vector<1x256xf32> to vector<8x256xf32>
    %17 = arith.addf %14, %16 : vector<8x256xf32>
    %cst_12 = arith.constant 0.000000e+00 : f32
    %18 = vector.broadcast %cst_12 : f32 to vector<8x256xf32>
    %19 = arith.cmpf ogt, %17, %18 : vector<8x256xf32>
    %cst_13 = arith.constant 2.000000e-01 : f32
    %20 = vector.broadcast %cst_13 : f32 to vector<8x256xf32>
    %21 = arith.mulf %20, %17 : vector<8x256xf32>
    %22 = arith.select %19, %17, %21 : vector<8x256xi1>, vector<8x256xf32>
    %23 = arith.truncf %22 : vector<8x256xf32> to vector<8x256xbf16>
    %c0_14 = arith.constant 0 : index
    %c0_15 = arith.constant 0 : index
    %24 = vector.load %arg6[%c0_14, %c0_15] : memref<256x128xbf16, #tpu.memory_space<vmem>>, vector<256x128xbf16>
    %cst_16 = arith.constant dense<0.000000e+00> : vector<8x128xf32>
    %25 = tpu.matmul %23, %24, %cst_16 {dimension_numbers = #tpu.dot_dimension_numbers<[1], [0], [0], [1], [0, 0, 1, 1], [], []>} : vector<8x256xbf16>, vector<256x128xbf16>, vector<8x128xf32> -> vector<8x128xf32>
    %c0_17 = arith.constant 0 : index
    %c0_18 = arith.constant 0 : index
    %26 = vector.load %arg7[%c0_17, %c0_18] : memref<1x128xf32, #tpu.memory_space<vmem>>, vector<1x128xf32>
    %27 = vector.broadcast %26 : vector<1x128xf32> to vector<8x128xf32>
    %28 = arith.addf %25, %27 : vector<8x128xf32>
    %29 = arith.negf %28 : vector<8x128xf32>
    %30 = math.exp %29 : vector<8x128xf32>
    %cst_19 = arith.constant 1.000000e+00 : f32
    %31 = vector.broadcast %cst_19 : f32 to vector<8x128xf32>
    %32 = arith.addf %31, %30 : vector<8x128xf32>
    %33 = arith.divf %31, %32 : vector<8x128xf32>
    %34 = arith.truncf %33 : vector<8x128xf32> to vector<8x128xbf16>
    %c0_20 = arith.constant 0 : index
    %c0_21 = arith.constant 0 : index
    %35 = vector.load %arg8[%c0_20, %c0_21] : memref<8x128xbf16, #tpu.memory_space<vmem>>, vector<8x128xbf16>
    tpu.vector_store %arg8[%c0_20, %c0_21], %34 {strides = array<i32>} : memref<8x128xbf16, #tpu.memory_space<vmem>>, vector<8x128xbf16>,
    return
  }
  func.func @transform_0(%arg0: i32) -> (i32, i32) {
    %c0_i32 = arith.constant 0 : i32
    %c0_i32_0 = arith.constant 0 : i32
    return %arg0, %c0_i32 : i32, i32
  }
  func.func @transform_1(%arg0: i32) -> (i32, i32) {
    %c0_i32 = arith.constant 0 : i32
    %c0_i32_0 = arith.constant 0 : i32
    %c0_i32_1 = arith.constant 0 : i32
    return %c0_i32, %c0_i32_0 : i32, i32
  }
  func.func @transform_2(%arg0: i32) -> (i32, i32) {
    %c0_i32 = arith.constant 0 : i32
    %c0_i32_0 = arith.constant 0 : i32
    %c0_i32_1 = arith.constant 0 : i32
    return %c0_i32, %c0_i32_0 : i32, i32
  }
  func.func @transform_3(%arg0: i32) -> (i32, i32) {
    %c0_i32 = arith.constant 0 : i32
    %c0_i32_0 = arith.constant 0 : i32
    %c0_i32_1 = arith.constant 0 : i32
    return %c0_i32, %c0_i32_0 : i32, i32
  }
  func.func @transform_4(%arg0: i32) -> (i32, i32) {
    %c0_i32 = arith.constant 0 : i32
    %c0_i32_0 = arith.constant 0 : i32
    %c0_i32_1 = arith.constant 0 : i32
    return %c0_i32, %c0_i32_0 : i32, i32
  }
  func.func @transform_5(%arg0: i32) -> (i32, i32) {
    %c0_i32 = arith.constant 0 : i32
    %c0_i32_0 = arith.constant 0 : i32
    %c0_i32_1 = arith.constant 0 : i32
    return %c0_i32, %c0_i32_0 : i32, i32
  }
  func.func @transform_6(%arg0: i32) -> (i32, i32) {
    %c0_i32 = arith.constant 0 : i32
    %c0_i32_0 = arith.constant 0 : i32
    %c0_i32_1 = arith.constant 0 : i32
    return %c0_i32, %c0_i32_0 : i32, i32
  }
  func.func @transform_7(%arg0: i32) -> (i32, i32) {
    %c0_i32 = arith.constant 0 : i32
    %c0_i32_0 = arith.constant 0 : i32
    return %arg0, %c0_i32 : i32, i32
  }
}

</mosaic_0001>

<bundles_post_ra>
// kernel: tpu_custom_call.1
= control target key start
LH: loop header
LB: loop body
LE: loop exit
PB: predicated region body
PF: predicated region fallthrough
CT: control target
= control target key end

     0   :  { %12 = vsyncpa [#allocation3], 0  ;;  %s3836_s0 = inlined_call_operand.hbm [shape: f32[8,1024], index: 0, kind: input, shape index: {}]   ;;  %s3837_s1 = inlined_call_operand.hbm [shape: bf16[1024,512], index: 1, kind: input, shape index: {}]   ;;  %s3838_s2 = inlined_call_operand.hbm [shape: f32[1,512], index: 2, kind: input, shape index: {}]   ;;  %s3839_s3 = inlined_call_operand.hbm [shape: bf16[512,256], index: 3, kind: input, shape index: {}]   ;;  %s3840_s4 = inlined_call_operand.vmem [shape: f32[1,256], index: 4, kind: input, shape index: {}]   ;;  %s3841_s5 = inlined_call_operand.hbm [shape: bf16[256,128], index: 5, kind: input, shape index: {}]   ;;  %s3842_s6 = inlined_call_operand.vmem [shape: f32[1,128], index: 6, kind: input, shape index: {}]   ;;  %s3843_s7 = inlined_call_operand.hbm [shape: bf16[8,128], index: 7, kind: output, shape index: {}]  }
   0x1   :  { %13 = vsyncpa [#allocation6], 0 }
   0x2   :  { %14 = vsyncpa [#allocation9], 0 }
   0x3   :  { %15 = vsyncpa [#allocation4], 0  ;;  %s3696_s24 = smov [#allocation5]  }
   0x4   :  { %s31_s25 = sshll.u32 %s3696_s24, 4  ;;  %s32_s25 = int_to_ptr.vmem [resolvable:$true] %s31_s25 }
   0x5   :  { %s3576_s26 = scalar_lea.vmem %s32_s25, 32768  ;;  %p3581_p1 = scmp.lt.s32.totalorder %s32_s25, %s32_s25 }
   0x6   :  { %p3577_p0 = scmp.ne.s32.totalorder %s32_s25, %s3576_s26  ;;  %p3582_p2 = scmp.lt.s32.totalorder %s3576_s26, %s3576_s26 }
   0x8   :  { %p3583_p3 = por %p3582_p2, %p3581_p1 }
   0xa   :  { %p3584_p4 = pnand %p3583_p3, %p3577_p0 }
   0xc   :  { %3587 = shalt.err (!%p3584_p4)
}
   0xd   :  { %s3697_s27 = smov 256   ;;  %s3698_s28 = smov 16  }
   0xe   :  { %37 = dma.hbm_to_vmem [thread:$0]  %s3837_s1, 32768, %s32_s25, [#allocation6], %s3697_s27, %s3697_s27, %s3698_s28  }
   0xf   :  { %s3699_s8 = smov [#allocation8]  }
  0x10   :  { %s53_s9 = sshll.u32 %s3699_s8, 4  ;;  %s54_s9 = int_to_ptr.vmem [resolvable:$true] %s53_s9 }
  0x11   :  { %s3596_s10 = scalar_lea.vmem %s54_s9, 8192  ;;  %p3601_p6 = scmp.lt.s32.totalorder %s54_s9, %s54_s9 }
  0x12   :  { %p3597_p5 = scmp.ne.s32.totalorder %s54_s9, %s3596_s10  ;;  %p3602_p7 = scmp.lt.s32.totalorder %s3596_s10, %s3596_s10 }
  0x14   :  { %p3603_p8 = por %p3602_p7, %p3601_p6 }
  0x16   :  { %p3604_p9 = pnand %p3603_p8, %p3597_p5 }
  0x18   :  { %3607 = shalt.err (!%p3604_p9)
}
  0x19   :  { %s3700_s11 = smov 128   ;;  %s3701_s12 = smov 8  }
  0x1a   :  { %59 = dma.hbm_to_vmem [thread:$0]  %s3839_s3, 8192, %s54_s9, [#allocation9], %s3700_s11, %s3700_s11, %s3701_s12  }
  0x1b   :  { %s3702_s15 = smov [#allocation2]   ;;  %s3703_s17 = smov [#allocation7]  }
  0x1c   :  { %s22_s16 = sshll.u32 %s3702_s15, 4  ;;  %s44_s1 = sshll.u32 %s3703_s17, 4  ;;  %s23_s16 = int_to_ptr.vmem [resolvable:$true] %s22_s16  ;;  %s45_s1 = int_to_ptr.vmem [resolvable:$true] %s44_s1 }
  0x1d   :  { %s3616_s18 = scalar_lea.vmem %s23_s16, 1024  ;;  %p3621_p11 = scmp.lt.s32.totalorder %s23_s16, %s23_s16 }
  0x1e   :  { %p3617_p10 = scmp.ne.s32.totalorder %s23_s16, %s3616_s18  ;;  %p3622_p12 = scmp.lt.s32.totalorder %s3616_s18, %s3616_s18 }
  0x20   :  { %p3623_p13 = por %p3622_p12, %p3621_p11 }
  0x22   :  { %p3624_p0 = pnand %p3623_p13, %p3617_p10 }
  0x24   :  { %3627 = shalt.err (!%p3624_p0)
}
  0x25   :  { %25 = dma.hbm_to_vmem [thread:$0]  %s3836_s0, 1024, %s23_s16, [#allocation3]  }
  0x26   :  { %s3636_s21 = scalar_lea.vmem %s45_s1, 64  ;;  %p3641_p2 = scmp.lt.s32.totalorder %s45_s1, %s45_s1 }
  0x27   :  { %p3637_p1 = scmp.ne.s32.totalorder %s45_s1, %s3636_s21  ;;  %p3642_p3 = scmp.lt.s32.totalorder %s3636_s21, %s3636_s21 }
  0x29   :  { %p3643_p4 = por %p3642_p3, %p3641_p2 }
  0x2b   :  { %p3644_p5 = pnand %p3643_p4, %p3637_p1 }
  0x2d   :  { %3647 = shalt.err (!%p3644_p5)
}
  0x2e   :  { %47 = dma.hbm_to_vmem [thread:$0]  %s3838_s2, 64, %s45_s1, [#allocation6]  }
  0x2f   :  { %s3704_s23 = smov [#allocation10]  }
  0x30   :  { %s67_s24 = sshll.u32 %s3704_s23, 4  ;;  %s68_s24 = int_to_ptr.vmem [resolvable:$true] %s67_s24 }
  0x31   :  { %s3656_s25 = scalar_lea.vmem %s68_s24, 2048  ;;  %p3661_p7 = scmp.lt.s32.totalorder %s68_s24, %s68_s24 }
  0x32   :  { %p3657_p6 = scmp.ne.s32.totalorder %s68_s24, %s3656_s25  ;;  %p3662_p8 = scmp.lt.s32.totalorder %s3656_s25, %s3656_s25 }
  0x34   :  { %p3663_p9 = por %p3662_p8, %p3661_p7 }
  0x36   :  { %p3664_p10 = pnand %p3663_p9, %p3657_p6 }
  0x38   :  { %3667 = shalt.err (!%p3664_p10)
}
  0x39   :  { %s3705_s0 = smov 64   ;;  %s3706_s26 = smov 4  }
  0x3a   :  { %73 = dma.hbm_to_vmem [thread:$0]  %s3841_s5, 2048, %s68_s24, [#allocation9], %s3705_s0, %s3705_s0, %s3706_s26  }
  0x3b   :  { %3688 = dma.done.wait [#allocation3], 1024  }
  0x3c   :  { %3689 = vsyncadd [#allocation3], 4294966272 }
  0x3d   :  { %3690 = dma.done.wait [#allocation6], 32832  }
  0x3e   :  { %3691 = vsyncadd [#allocation6], 4294934464 }
  0x3f   :  { %3692 = dma.done.wait [#allocation9], 10240  }
  0x40   :  { %3693 = vsyncadd [#allocation9], 4294957056  ;;  %v3068_v0 = vld [vmem:[#allocation5 + $0xe4] ss:$16 sps:$4 sm:$0xff]   ;;  %v3072_v2 = vld [vmem:[#allocation5 + $0xe0] ss:$16 sps:$4 sm:$0xff]  }
  0x41   :  { %v3070_v1 = vld [vmem:[#allocation5 + $0x2e4] ss:$16 sps:$4 sm:$0xff]   ;;  %1666 = vmatprep.subr.bf16.mxu0 %v3068_v0  ;;  %v3073_v3 = vld [vmem:[#allocation5 + $0x2e0] ss:$16 sps:$4 sm:$0xff]   ;;  %v93_v46 = vld [vmem:[#allocation2 + $0x8] sm:$0xff]  ;;  %s3707_s30 = smov [#allocation11]  }
  0x42   :  { %1707 = vmatprep.subr.bf16.mxu1 %v3070_v1  ;;  %v3074_v4 = vld [vmem:[#allocation5 + $0xc4] ss:$16 sps:$4 sm:$0xff]   ;;  %1667 = vmatpush1.bf16.msra.mxu0 %v3072_v2  ;;  %v3078_v6 = vld [vmem:[#allocation5 + $0xc0] ss:$16 sps:$4 sm:$0xff]   ;;  %v3763_v49 = vpack.c.bf16 %v93_v46, %v93_v46  ;;  %v95_v50 = vld [vmem:[#allocation2 + $0x18] sm:$0xff]  ;;  %s2685_s8 = sshll.u32 %s3707_s30, 4  ;;  %s2686_s8 = int_to_ptr.vmem [resolvable:$true] %s2685_s8 }
  0x43   :  { %1708 = vmatpush1.bf16.msra.mxu1 %v3073_v3  ;;  %v3076_v5 = vld [vmem:[#allocation5 + $0x2c4] ss:$16 sps:$4 sm:$0xff]   ;;  %1668 = vmatprep.subr.bf16.mxu0 %v3074_v4  ;;  %v3079_v7 = vld [vmem:[#allocation5 + $0x2c0] ss:$16 sps:$4 sm:$0xff]   ;;  %v3765_v52 = vpack.c.bf16 %v95_v50, %v95_v50  ;;  %s3668_s9 = scalar_lea.vmem %s2686_s8, 64  ;;  %p3673_p12 = scmp.lt.s32.totalorder %s2686_s8, %s2686_s8 }
  0x44   :  { %1709 = vmatprep.subr.bf16.mxu1 %v3076_v5  ;;  %v3080_v8 = vld [vmem:[#allocation5 + $0xa4] ss:$16 sps:$4 sm:$0xff]   ;;  %v3084_v10 = vld [vmem:[#allocation5 + $0xa0] ss:$16 sps:$4 sm:$0xff]   ;;  %1698 = vmatprep.mubr.bf16.mxu0 %v3763_v49  ;;  %p3669_p11 = scmp.ne.s32.totalorder %s2686_s8, %s3668_s9  ;;  %p3674_p13 = scmp.lt.s32.totalorder %s3668_s9, %s3668_s9 }
  0x45   :  { %v3082_v9 = vld [vmem:[#allocation5 + $0x2a4] ss:$16 sps:$4 sm:$0xff]   ;;  %v3085_v11 = vld [vmem:[#allocation5 + $0x2a0] ss:$16 sps:$4 sm:$0xff]   ;;  %1739 = vmatprep.mubr.bf16.mxu1 %v3765_v52 }
  0x46   :  { %1669 = vmatpush1.bf16.msra.mxu0 %v3078_v6  ;;  %v3086_v12 = vld [vmem:[#allocation5 + $0x84] ss:$16 sps:$4 sm:$0xff]   ;;  %v3090_v14 = vld [vmem:[#allocation5 + $0x80] ss:$16 sps:$4 sm:$0xff]   ;;  %p3675_p0 = por %p3674_p13, %p3673_p12 }
  0x47   :  { %1710 = vmatpush1.bf16.msra.mxu1 %v3079_v7  ;;  %1670 = vmatprep.subr.bf16.mxu0 %v3080_v8  ;;  %v3088_v13 = vld [vmem:[#allocation5 + $0x284] ss:$16 sps:$4 sm:$0xff]   ;;  %v3091_v15 = vld [vmem:[#allocation5 + $0x280] ss:$16 sps:$4 sm:$0xff]  }
  0x48   :  { %1711 = vmatprep.subr.bf16.mxu1 %v3082_v9  ;;  %v3092_v16 = vld [vmem:[#allocation5 + $0x64] ss:$16 sps:$4 sm:$0xff]   ;;  %v3096_v18 = vld [vmem:[#allocation5 + $0x60] ss:$16 sps:$4 sm:$0xff]   ;;  %p3676_p1 = pnand %p3675_p0, %p3669_p11 }
  0x49   :  { %v3094_v17 = vld [vmem:[#allocation5 + $0x264] ss:$16 sps:$4 sm:$0xff]   ;;  %v3097_v19 = vld [vmem:[#allocation5 + $0x260] ss:$16 sps:$4 sm:$0xff]  }
  0x4a   :  { %1671 = vmatpush1.bf16.msra.mxu0 %v3084_v10  ;;  %v3098_v20 = vld [vmem:[#allocation5 + $0x44] ss:$16 sps:$4 sm:$0xff]   ;;  %v3102_v22 = vld [vmem:[#allocation5 + $0x40] ss:$16 sps:$4 sm:$0xff]  }
  0x4b   :  { %1712 = vmatpush1.bf16.msra.mxu1 %v3085_v11  ;;  %1672 = vmatprep.subr.bf16.mxu0 %v3086_v12  ;;  %v3100_v21 = vld [vmem:[#allocation5 + $0x244] ss:$16 sps:$4 sm:$0xff]   ;;  %v3103_v23 = vld [vmem:[#allocation5 + $0x240] ss:$16 sps:$4 sm:$0xff]  }
  0x4c   :  { %1713 = vmatprep.subr.bf16.mxu1 %v3088_v13  ;;  %v3104_v24 = vld [vmem:[#allocation5 + $0x24] ss:$16 sps:$4 sm:$0xff]   ;;  %v3108_v26 = vld [vmem:[#allocation5 + $0x20] ss:$16 sps:$4 sm:$0xff]  }
  0x4d   :  { %v3106_v25 = vld [vmem:[#allocation5 + $0x224] ss:$16 sps:$4 sm:$0xff]   ;;  %v3109_v27 = vld [vmem:[#allocation5 + $0x220] ss:$16 sps:$4 sm:$0xff]  }
  0x4e   :  { %1673 = vmatpush1.bf16.msra.mxu0 %v3090_v14  ;;  %v3110_v28 = vld [vmem:[#allocation5 + $0x4] ss:$16 sps:$4 sm:$0xff]   ;;  %v3114_v30 = vld [vmem:[#allocation5] ss:$16 sps:$4 sm:$0xff]  }
  0x4f   :  { %1714 = vmatpush1.bf16.msra.mxu1 %v3091_v15  ;;  %1674 = vmatprep.subr.bf16.mxu0 %v3092_v16  ;;  %v3112_v29 = vld [vmem:[#allocation5 + $0x204] ss:$16 sps:$4 sm:$0xff]   ;;  %v3115_v31 = vld [vmem:[#allocation5 + $0x200] ss:$16 sps:$4 sm:$0xff]  }
  0x50   :  { %1715 = vmatprep.subr.bf16.mxu1 %v3094_v17  ;;  %v3116_v32 = vld [vmem:[#allocation5 + $0x1e4] ss:$16 sps:$4 sm:$0xff]   ;;  %v3120_v34 = vld [vmem:[#allocation5 + $0x1e0] ss:$16 sps:$4 sm:$0xff]  }
  0x51   :  { %v3118_v33 = vld [vmem:[#allocation5 + $0x3e4] ss:$16 sps:$4 sm:$0xff]   ;;  %v3121_v35 = vld [vmem:[#allocation5 + $0x3e0] ss:$16 sps:$4 sm:$0xff]  }
  0x52   :  { %1675 = vmatpush1.bf16.msra.mxu0 %v3096_v18  ;;  %v3122_v36 = vld [vmem:[#allocation5 + $0x1c4] ss:$16 sps:$4 sm:$0xff]   ;;  %v3126_v38 = vld [vmem:[#allocation5 + $0x1c0] ss:$16 sps:$4 sm:$0xff]  }
  0x53   :  { %1716 = vmatpush1.bf16.msra.mxu1 %v3097_v19  ;;  %1676 = vmatprep.subr.bf16.mxu0 %v3098_v20  ;;  %v3124_v37 = vld [vmem:[#allocation5 + $0x3c4] ss:$16 sps:$4 sm:$0xff]   ;;  %v3127_v39 = vld [vmem:[#allocation5 + $0x3c0] ss:$16 sps:$4 sm:$0xff]  }
  0x54   :  { %1717 = vmatprep.subr.bf16.mxu1 %v3100_v21  ;;  %v3128_v40 = vld [vmem:[#allocation5 + $0x1a4] ss:$16 sps:$4 sm:$0xff]   ;;  %v3132_v42 = vld [vmem:[#allocation5 + $0x1a0] ss:$16 sps:$4 sm:$0xff]  }
  0x55   :  { %v3130_v41 = vld [vmem:[#allocation5 + $0x3a4] ss:$16 sps:$4 sm:$0xff]   ;;  %v3133_v43 = vld [vmem:[#allocation5 + $0x3a0] ss:$16 sps:$4 sm:$0xff]  }
  0x56   :  { %1677 = vmatpush1.bf16.msra.mxu0 %v3102_v22  ;;  %v3134_v44 = vld [vmem:[#allocation5 + $0x184] ss:$16 sps:$4 sm:$0xff]   ;;  %v3138_v47 = vld [vmem:[#allocation5 + $0x180] ss:$16 sps:$4 sm:$0xff]  }
  0x57   :  { %1718 = vmatpush1.bf16.msra.mxu1 %v3103_v23  ;;  %1678 = vmatprep.subr.bf16.mxu0 %v3104_v24  ;;  %v3136_v45 = vld [vmem:[#allocation5 + $0x384] ss:$16 sps:$4 sm:$0xff]   ;;  %v3139_v48 = vld [vmem:[#allocation5 + $0x380] ss:$16 sps:$4 sm:$0xff]  }
  0x58   :  { %1719 = vmatprep.subr.bf16.mxu1 %v3106_v25  ;;  %v3140_v51 = vld [vmem:[#allocation5 + $0x164] ss:$16 sps:$4 sm:$0xff]   ;;  %v3144_v54 = vld [vmem:[#allocation5 + $0x160] ss:$16 sps:$4 sm:$0xff]  }
  0x59   :  { %v3142_v53 = vld [vmem:[#allocation5 + $0x364] ss:$16 sps:$4 sm:$0xff]   ;;  %v3145_v55 = vld [vmem:[#allocation5 + $0x360] ss:$16 sps:$4 sm:$0xff]  }
  0x5a   :  { %1679 = vmatpush1.bf16.msra.mxu0 %v3108_v26  ;;  %v3146_v56 = vld [vmem:[#allocation5 + $0x144] ss:$16 sps:$4 sm:$0xff]   ;;  %v3150_v58 = vld [vmem:[#allocation5 + $0x140] ss:$16 sps:$4 sm:$0xff]  }
  0x5b   :  { %1720 = vmatpush1.bf16.msra.mxu1 %v3109_v27  ;;  %1680 = vmatprep.subr.bf16.mxu0 %v3110_v28  ;;  %v3148_v57 = vld [vmem:[#allocation5 + $0x344] ss:$16 sps:$4 sm:$0xff]   ;;  %v3151_v59 = vld [vmem:[#allocation5 + $0x340] ss:$16 sps:$4 sm:$0xff]  }
  0x5c   :  { %1721 = vmatprep.subr.bf16.mxu1 %v3112_v29  ;;  %v3152_v60 = vld [vmem:[#allocation5 + $0x124] ss:$16 sps:$4 sm:$0xff]   ;;  %v3156_v62 = vld [vmem:[#allocation5 + $0x120] ss:$16 sps:$4 sm:$0xff]  }
  0x5d   :  { %v3154_v61 = vld [vmem:[#allocation5 + $0x324] ss:$16 sps:$4 sm:$0xff]   ;;  %v3157_v63 = vld [vmem:[#allocation5 + $0x320] ss:$16 sps:$4 sm:$0xff]  }
  0x5e   :  { %1681 = vmatpush1.bf16.msra.mxu0 %v3114_v30  ;;  %v3158_v0 = vld [vmem:[#allocation5 + $0x104] ss:$16 sps:$4 sm:$0xff]   ;;  %v3162_v2 = vld [vmem:[#allocation5 + $0x100] ss:$16 sps:$4 sm:$0xff]  }
  0x5f   :  { %1722 = vmatpush1.bf16.msra.mxu1 %v3115_v31  ;;  %1682 = vmatprep.subr.bf16.mxu0 %v3116_v32  ;;  %v3160_v1 = vld [vmem:[#allocation5 + $0x304] ss:$16 sps:$4 sm:$0xff]   ;;  %v3163_v3 = vld [vmem:[#allocation5 + $0x300] ss:$16 sps:$4 sm:$0xff]  }
  0x60   :  { %1723 = vmatprep.subr.bf16.mxu1 %v3118_v33  ;;  %v92_v4 = vld [vmem:[#allocation2] sm:$0xff]  ;;  %v94_v5 = vld [vmem:[#allocation2 + $0x10] sm:$0xff] }
  0x61   :  { %v3166_v6 = vld [vmem:[#allocation5 + $0x4e4] ss:$16 sps:$4 sm:$0xff]   ;;  %v3769_v8 = vpack.c.bf16 %v92_v4, %v92_v4  ;;  %v3771_v9 = vpack.c.bf16 %v94_v5, %v94_v5  ;;  %v3164_v10 = vld [vmem:[#allocation5 + $0x4e0] ss:$16 sps:$4 sm:$0xff]  }
  0x62   :  { %1683 = vmatpush2.bf16.msra.mxu0 %v3120_v34  ;;  %v3169_v7 = vld [vmem:[#allocation5 + $0x6e4] ss:$16 sps:$4 sm:$0xff]   ;;  %v3167_v11 = vld [vmem:[#allocation5 + $0x6e0] ss:$16 sps:$4 sm:$0xff]   ;;  %v97_v34 = vld [vmem:[#allocation2 + $0x28] sm:$0xff] }
  0x63   :  { %1724 = vmatpush2.bf16.msra.mxu1 %v3121_v35  ;;  %1684 = vmatprep.subr.bf16.mxu0 %v3122_v36  ;;  %v3172_v12 = vld [vmem:[#allocation5 + $0x4c4] ss:$16 sps:$4 sm:$0xff]   ;;  %v3170_v14 = vld [vmem:[#allocation5 + $0x4c0] ss:$16 sps:$4 sm:$0xff]  }
  0x64   :  { %1725 = vmatprep.subr.bf16.mxu1 %v3124_v37  ;;  %v3175_v13 = vld [vmem:[#allocation5 + $0x6c4] ss:$16 sps:$4 sm:$0xff]   ;;  %v3173_v15 = vld [vmem:[#allocation5 + $0x6c0] ss:$16 sps:$4 sm:$0xff]   ;;  %v3775_v37 = vpack.c.bf16 %v97_v34, %v97_v34  ;;  %v3278_v34 = vld [vmem:[#allocation5 + $0x88] ss:$16 sps:$4 sm:$0xff]  }
  0x65   :  { %v3178_v16 = vld [vmem:[#allocation5 + $0x4a4] ss:$16 sps:$4 sm:$0xff]   ;;  %v3176_v18 = vld [vmem:[#allocation5 + $0x4a0] ss:$16 sps:$4 sm:$0xff]  }
  0x66   :  { %1685 = vmatpush2.bf16.msra.mxu0 %v3126_v38  ;;  %v3181_v17 = vld [vmem:[#allocation5 + $0x6a4] ss:$16 sps:$4 sm:$0xff]   ;;  %v3179_v19 = vld [vmem:[#allocation5 + $0x6a0] ss:$16 sps:$4 sm:$0xff]   ;;  %v99_v38 = vld [vmem:[#allocation2 + $0x38] sm:$0xff] }
  0x67   :  { %1726 = vmatpush2.bf16.msra.mxu1 %v3127_v39  ;;  %1686 = vmatprep.subr.bf16.mxu0 %v3128_v40  ;;  %v3184_v20 = vld [vmem:[#allocation5 + $0x484] ss:$16 sps:$4 sm:$0xff]   ;;  %v3182_v22 = vld [vmem:[#allocation5 + $0x480] ss:$16 sps:$4 sm:$0xff]   ;;  %v3777_v40 = vpack.c.bf16 %v99_v38, %v99_v38  ;;  %v3289_v38 = vld [vmem:[#allocation5 + $0x26c] ss:$16 sps:$4 sm:$0xff]  }
  0x68   :  { %1727 = vmatprep.subr.bf16.mxu1 %v3130_v41  ;;  %v3187_v21 = vld [vmem:[#allocation5 + $0x684] ss:$16 sps:$4 sm:$0xff]   ;;  %v3185_v23 = vld [vmem:[#allocation5 + $0x680] ss:$16 sps:$4 sm:$0xff]  }
  0x69   :  { %v3190_v24 = vld [vmem:[#allocation5 + $0x464] ss:$16 sps:$4 sm:$0xff]   ;;  %v3188_v26 = vld [vmem:[#allocation5 + $0x460] ss:$16 sps:$4 sm:$0xff]  }
  0x6a   :  { %1687 = vmatpush2.bf16.msra.mxu0 %v3132_v42  ;;  %v3193_v25 = vld [vmem:[#allocation5 + $0x664] ss:$16 sps:$4 sm:$0xff]   ;;  %v3191_v27 = vld [vmem:[#allocation5 + $0x660] ss:$16 sps:$4 sm:$0xff]  }
  0x6b   :  { %1728 = vmatpush2.bf16.msra.mxu1 %v3133_v43  ;;  %1688 = vmatprep.subr.bf16.mxu0 %v3134_v44  ;;  %v3196_v28 = vld [vmem:[#allocation5 + $0x444] ss:$16 sps:$4 sm:$0xff]   ;;  %v3194_v30 = vld [vmem:[#allocation5 + $0x440] ss:$16 sps:$4 sm:$0xff]  }
  0x6c   :  { %1729 = vmatprep.subr.bf16.mxu1 %v3136_v45  ;;  %v3199_v29 = vld [vmem:[#allocation5 + $0x644] ss:$16 sps:$4 sm:$0xff]   ;;  %v3197_v31 = vld [vmem:[#allocation5 + $0x640] ss:$16 sps:$4 sm:$0xff]  }
  0x6d   :  { %v3202_v32 = vld [vmem:[#allocation5 + $0x424] ss:$16 sps:$4 sm:$0xff]   ;;  %v3200_v35 = vld [vmem:[#allocation5 + $0x420] ss:$16 sps:$4 sm:$0xff]  }
  0x6e   :  { %1689 = vmatpush2.bf16.msra.mxu0 %v3138_v47  ;;  %v3205_v33 = vld [vmem:[#allocation5 + $0x624] ss:$16 sps:$4 sm:$0xff]   ;;  %v3203_v36 = vld [vmem:[#allocation5 + $0x620] ss:$16 sps:$4 sm:$0xff]  }
  0x6f   :  { %1730 = vmatpush2.bf16.msra.mxu1 %v3139_v48  ;;  %1690 = vmatprep.subr.bf16.mxu0 %v3140_v51  ;;  %v3208_v39 = vld [vmem:[#allocation5 + $0x404] ss:$16 sps:$4 sm:$0xff]   ;;  %v3206_v42 = vld [vmem:[#allocation5 + $0x400] ss:$16 sps:$4 sm:$0xff]  }
  0x70   :  { %1731 = vmatprep.subr.bf16.mxu1 %v3142_v53  ;;  %v3211_v41 = vld [vmem:[#allocation5 + $0x604] ss:$16 sps:$4 sm:$0xff]   ;;  %v3209_v43 = vld [vmem:[#allocation5 + $0x600] ss:$16 sps:$4 sm:$0xff]  }
  0x71   :  { %v3214_v44 = vld [vmem:[#allocation5 + $0x5e4] ss:$16 sps:$4 sm:$0xff]   ;;  %v3212_v46 = vld [vmem:[#allocation5 + $0x5e0] ss:$16 sps:$4 sm:$0xff]  }
  0x72   :  { %1691 = vmatpush2.bf16.msra.mxu0 %v3144_v54  ;;  %v3217_v45 = vld [vmem:[#allocation5 + $0x7e4] ss:$16 sps:$4 sm:$0xff]   ;;  %v3215_v47 = vld [vmem:[#allocation5 + $0x7e0] ss:$16 sps:$4 sm:$0xff]  }
  0x73   :  { %1732 = vmatpush2.bf16.msra.mxu1 %v3145_v55  ;;  %1692 = vmatprep.subr.bf16.mxu0 %v3146_v56  ;;  %v3220_v48 = vld [vmem:[#allocation5 + $0x5c4] ss:$16 sps:$4 sm:$0xff]   ;;  %v3218_v51 = vld [vmem:[#allocation5 + $0x5c0] ss:$16 sps:$4 sm:$0xff]  }
  0x74   :  { %1733 = vmatprep.subr.bf16.mxu1 %v3148_v57  ;;  %v3223_v50 = vld [vmem:[#allocation5 + $0x7c4] ss:$16 sps:$4 sm:$0xff]   ;;  %v3221_v53 = vld [vmem:[#allocation5 + $0x7c0] ss:$16 sps:$4 sm:$0xff]  }
  0x75   :  { %v3226_v54 = vld [vmem:[#allocation5 + $0x5a4] ss:$16 sps:$4 sm:$0xff]   ;;  %v3224_v56 = vld [vmem:[#allocation5 + $0x5a0] ss:$16 sps:$4 sm:$0xff]  }
  0x76   :  { %1693 = vmatpush2.bf16.msra.mxu0 %v3150_v58  ;;  %v3229_v55 = vld [vmem:[#allocation5 + $0x7a4] ss:$16 sps:$4 sm:$0xff]   ;;  %v3227_v57 = vld [vmem:[#allocation5 + $0x7a0] ss:$16 sps:$4 sm:$0xff]  }
  0x77   :  { %1734 = vmatpush2.bf16.msra.mxu1 %v3151_v59  ;;  %1694 = vmatprep.subr.bf16.mxu0 %v3152_v60  ;;  %v3232_v58 = vld [vmem:[#allocation5 + $0x584] ss:$16 sps:$4 sm:$0xff]   ;;  %v3230_v60 = vld [vmem:[#allocation5 + $0x580] ss:$16 sps:$4 sm:$0xff]  }
  0x78   :  { %1735 = vmatprep.subr.bf16.mxu1 %v3154_v61  ;;  %v3235_v59 = vld [vmem:[#allocation5 + $0x784] ss:$16 sps:$4 sm:$0xff]   ;;  %v3233_v61 = vld [vmem:[#allocation5 + $0x780] ss:$16 sps:$4 sm:$0xff]  }
  0x79   :  { %v3242_v4 = vld [vmem:[#allocation5 + $0x540] ss:$16 sps:$4 sm:$0xff]  }
  0x7a   :  { %1695 = vmatpush2.bf16.msra.mxu0 %v3156_v62  ;;  %v3238_v62 = vld [vmem:[#allocation5 + $0x564] ss:$16 sps:$4 sm:$0xff]   ;;  %v3245_v5 = vld [vmem:[#allocation5 + $0x740] ss:$16 sps:$4 sm:$0xff]  }
  0x7b   :  { %1736 = vmatpush2.bf16.msra.mxu1 %v3157_v63  ;;  %1696 = vmatprep.subr.bf16.mxu0 %v3158_v0  ;;  %v3241_v63 = vld [vmem:[#allocation5 + $0x764] ss:$16 sps:$4 sm:$0xff]   ;;  %v3236_v0 = vld [vmem:[#allocation5 + $0x560] ss:$16 sps:$4 sm:$0xff]  }
  0x7c   :  { %1737 = vmatprep.subr.bf16.mxu1 %v3160_v1  ;;  %v3239_v1 = vld [vmem:[#allocation5 + $0x760] ss:$16 sps:$4 sm:$0xff]  }
  0x7e   :  { %1697 = vmatpush2.bf16.msra.mxu0 %v3162_v2  ;;  %v3244_v2 = vld [vmem:[#allocation5 + $0x544] ss:$16 sps:$4 sm:$0xff]  }
  0x7f   :  { %1738 = vmatpush2.bf16.msra.mxu1 %v3163_v3  ;;  %1748 = vmatprep.subr.bf16.mxu0 %v3166_v6  ;;  %v3247_v3 = vld [vmem:[#allocation5 + $0x744] ss:$16 sps:$4 sm:$0xff]  }
  0x80   :  { %1789 = vmatprep.subr.bf16.mxu1 %v3169_v7  ;;  %v3250_v6 = vld [vmem:[#allocation5 + $0x524] ss:$16 sps:$4 sm:$0xff]  }
  0x81   :  { %1699 = vmatmul.mubr.bf16.vlgmr.msra.gmra.mxu0 %v3769_v8  ;;  %v3253_v7 = vld [vmem:[#allocation5 + $0x724] ss:$16 sps:$4 sm:$0xff]  }
  0x82   :  { %1740 = vmatmul.mubr.bf16.vlgmr.msra.gmra.mxu1 %v3771_v9  ;;  %1749 = vmatpush1.bf16.msra.mxu0 %v3164_v10  ;;  %v3248_v10 = vld [vmem:[#allocation5 + $0x520] ss:$16 sps:$4 sm:$0xff]  }
  0x83   :  { %1790 = vmatpush1.bf16.msra.mxu1 %v3167_v11  ;;  %1750 = vmatprep.subr.bf16.mxu0 %v3172_v12  ;;  %v3251_v11 = vld [vmem:[#allocation5 + $0x720] ss:$16 sps:$4 sm:$0xff]   ;;  %v3256_v12 = vld [vmem:[#allocation5 + $0x504] ss:$16 sps:$4 sm:$0xff]  }
  0x84   :  { %1791 = vmatprep.subr.bf16.mxu1 %v3175_v13  ;;  %1780 = vmatprep.mubr.bf16.mxu0 %v3775_v37  ;;  %v3259_v13 = vld [vmem:[#allocation5 + $0x704] ss:$16 sps:$4 sm:$0xff]  }
  0x85   :  { %1821 = vmatprep.mubr.bf16.mxu1 %v3777_v40 }
  0x86   :  { %1751 = vmatpush1.bf16.msra.mxu0 %v3170_v14  ;;  %v3254_v14 = vld [vmem:[#allocation5 + $0x500] ss:$16 sps:$4 sm:$0xff]  }
  0x87   :  { %1792 = vmatpush1.bf16.msra.mxu1 %v3173_v15  ;;  %1752 = vmatprep.subr.bf16.mxu0 %v3178_v16  ;;  %v3257_v15 = vld [vmem:[#allocation5 + $0x700] ss:$16 sps:$4 sm:$0xff]  }
  0x88   :  { %1793 = vmatprep.subr.bf16.mxu1 %v3181_v17  ;;  %v96_v16 = vld [vmem:[#allocation2 + $0x20] sm:$0xff]  ;;  %v98_v17 = vld [vmem:[#allocation2 + $0x30] sm:$0xff] }
  0x8a   :  { %1753 = vmatpush1.bf16.msra.mxu0 %v3176_v18  ;;  %v3262_v18 = vld [vmem:[#allocation5 + $0xec] ss:$16 sps:$4 sm:$0xff]  }
  0x8b   :  { %1794 = vmatpush1.bf16.msra.mxu1 %v3179_v19  ;;  %1754 = vmatprep.subr.bf16.mxu0 %v3184_v20  ;;  %v3265_v19 = vld [vmem:[#allocation5 + $0x2ec] ss:$16 sps:$4 sm:$0xff]   ;;  %v3781_v20 = vpack.c.bf16 %v96_v16, %v96_v16 }
  0x8c   :  { %1795 = vmatprep.subr.bf16.mxu1 %v3187_v21  ;;  %v3783_v21 = vpack.c.bf16 %v98_v17, %v98_v17  ;;  %v3346_v16 = vld [vmem:[#allocation5 + $0x12c] ss:$16 sps:$4 sm:$0xff]  }
  0x8d   :  { %v3349_v17 = vld [vmem:[#allocation5 + $0x32c] ss:$16 sps:$4 sm:$0xff]  }
  0x8e   :  { %1755 = vmatpush1.bf16.msra.mxu0 %v3182_v22  ;;  %v3260_v22 = vld [vmem:[#allocation5 + $0xe8] ss:$16 sps:$4 sm:$0xff]  }
  0x8f   :  { %1796 = vmatpush1.bf16.msra.mxu1 %v3185_v23  ;;  %1756 = vmatprep.subr.bf16.mxu0 %v3190_v24  ;;  %v3263_v23 = vld [vmem:[#allocation5 + $0x2e8] ss:$16 sps:$4 sm:$0xff]   ;;  %v3268_v24 = vld [vmem:[#allocation5 + $0xcc] ss:$16 sps:$4 sm:$0xff]  }
  0x90   :  { %1797 = vmatprep.subr.bf16.mxu1 %v3193_v25  ;;  %v3271_v25 = vld [vmem:[#allocation5 + $0x2cc] ss:$16 sps:$4 sm:$0xff]  }
  0x92   :  { %1757 = vmatpush1.bf16.msra.mxu0 %v3188_v26  ;;  %v3266_v26 = vld [vmem:[#allocation5 + $0xc8] ss:$16 sps:$4 sm:$0xff]  }
  0x93   :  { %1798 = vmatpush1.bf16.msra.mxu1 %v3191_v27  ;;  %1758 = vmatprep.subr.bf16.mxu0 %v3196_v28  ;;  %v3269_v27 = vld [vmem:[#allocation5 + $0x2c8] ss:$16 sps:$4 sm:$0xff]   ;;  %v3274_v28 = vld [vmem:[#allocation5 + $0xac] ss:$16 sps:$4 sm:$0xff]  }
  0x94   :  { %1799 = vmatprep.subr.bf16.mxu1 %v3199_v29  ;;  %v3277_v29 = vld [vmem:[#allocation5 + $0x2ac] ss:$16 sps:$4 sm:$0xff]  }
  0x96   :  { %1759 = vmatpush1.bf16.msra.mxu0 %v3194_v30  ;;  %v3272_v30 = vld [vmem:[#allocation5 + $0xa8] ss:$16 sps:$4 sm:$0xff]  }
  0x97   :  { %1800 = vmatpush1.bf16.msra.mxu1 %v3197_v31  ;;  %1760 = vmatprep.subr.bf16.mxu0 %v3202_v32  ;;  %v3275_v31 = vld [vmem:[#allocation5 + $0x2a8] ss:$16 sps:$4 sm:$0xff]   ;;  %v3280_v32 = vld [vmem:[#allocation5 + $0x8c] ss:$16 sps:$4 sm:$0xff]  }
  0x98   :  { %1801 = vmatprep.subr.bf16.mxu1 %v3205_v33  ;;  %v3283_v33 = vld [vmem:[#allocation5 + $0x28c] ss:$16 sps:$4 sm:$0xff]  }
  0x9a   :  { %1761 = vmatpush1.bf16.msra.mxu0 %v3200_v35  ;;  %v3281_v35 = vld [vmem:[#allocation5 + $0x288] ss:$16 sps:$4 sm:$0xff]  }
  0x9b   :  { %1802 = vmatpush1.bf16.msra.mxu1 %v3203_v36  ;;  %1762 = vmatprep.subr.bf16.mxu0 %v3208_v39  ;;  %v3286_v36 = vld [vmem:[#allocation5 + $0x6c] ss:$16 sps:$4 sm:$0xff]   ;;  %v3284_v39 = vld [vmem:[#allocation5 + $0x68] ss:$16 sps:$4 sm:$0xff]  }
  0x9c   :  { %1803 = vmatprep.subr.bf16.mxu1 %v3211_v41  ;;  %v3295_v41 = vld [vmem:[#allocation5 + $0x24c] ss:$16 sps:$4 sm:$0xff]  }
  0x9e   :  { %1763 = vmatpush1.bf16.msra.mxu0 %v3206_v42  ;;  %v3290_v42 = vld [vmem:[#allocation5 + $0x48] ss:$16 sps:$4 sm:$0xff]  }
  0x9f   :  { %1804 = vmatpush1.bf16.msra.mxu1 %v3209_v43  ;;  %1764 = vmatprep.subr.bf16.mxu0 %v3214_v44  ;;  %v3293_v43 = vld [vmem:[#allocation5 + $0x248] ss:$16 sps:$4 sm:$0xff]   ;;  %v3298_v44 = vld [vmem:[#allocation5 + $0x2c] ss:$16 sps:$4 sm:$0xff]  }
  0xa0   :  { %1805 = vmatprep.subr.bf16.mxu1 %v3217_v45  ;;  %v3301_v45 = vld [vmem:[#allocation5 + $0x22c] ss:$16 sps:$4 sm:$0xff]  }
  0xa2   :  { %1765 = vmatpush2.bf16.msra.mxu0 %v3212_v46  ;;  %v3296_v46 = vld [vmem:[#allocation5 + $0x28] ss:$16 sps:$4 sm:$0xff]  }
  0xa3   :  { %1806 = vmatpush2.bf16.msra.mxu1 %v3215_v47  ;;  %1766 = vmatprep.subr.bf16.mxu0 %v3220_v48  ;;  %v3299_v47 = vld [vmem:[#allocation5 + $0x228] ss:$16 sps:$4 sm:$0xff]   ;;  %v3304_v48 = vld [vmem:[#allocation5 + $0xc] ss:$16 sps:$4 sm:$0xff]  }
  0xa4   :  { %1807 = vmatprep.subr.bf16.mxu1 %v3223_v50  ;;  %v3307_v50 = vld [vmem:[#allocation5 + $0x20c] ss:$16 sps:$4 sm:$0xff]  }
  0xa6   :  { %1767 = vmatpush2.bf16.msra.mxu0 %v3218_v51  ;;  %v3302_v51 = vld [vmem:[#allocation5 + $0x8] ss:$16 sps:$4 sm:$0xff]  }
  0xa7   :  { %1808 = vmatpush2.bf16.msra.mxu1 %v3221_v53  ;;  %1768 = vmatprep.subr.bf16.mxu0 %v3226_v54  ;;  %v3305_v53 = vld [vmem:[#allocation5 + $0x208] ss:$16 sps:$4 sm:$0xff]   ;;  %v3310_v54 = vld [vmem:[#allocation5 + $0x1ec] ss:$16 sps:$4 sm:$0xff]  }
  0xa8   :  { %1809 = vmatprep.subr.bf16.mxu1 %v3229_v55  ;;  %v3313_v55 = vld [vmem:[#allocation5 + $0x3ec] ss:$16 sps:$4 sm:$0xff]  }
  0xaa   :  { %1769 = vmatpush2.bf16.msra.mxu0 %v3224_v56  ;;  %v3308_v56 = vld [vmem:[#allocation5 + $0x1e8] ss:$16 sps:$4 sm:$0xff]  }
  0xab   :  { %1810 = vmatpush2.bf16.msra.mxu1 %v3227_v57  ;;  %1770 = vmatprep.subr.bf16.mxu0 %v3232_v58  ;;  %v3311_v57 = vld [vmem:[#allocation5 + $0x3e8] ss:$16 sps:$4 sm:$0xff]   ;;  %v3316_v58 = vld [vmem:[#allocation5 + $0x1cc] ss:$16 sps:$4 sm:$0xff]  }
  0xac   :  { %1811 = vmatprep.subr.bf16.mxu1 %v3235_v59  ;;  %v3319_v59 = vld [vmem:[#allocation5 + $0x3cc] ss:$16 sps:$4 sm:$0xff]  }
  0xae   :  { %1771 = vmatpush2.bf16.msra.mxu0 %v3230_v60  ;;  %v3314_v60 = vld [vmem:[#allocation5 + $0x1c8] ss:$16 sps:$4 sm:$0xff]  }
  0xaf   :  { %1812 = vmatpush2.bf16.msra.mxu1 %v3233_v61  ;;  %1772 = vmatprep.subr.bf16.mxu0 %v3238_v62  ;;  %v3317_v61 = vld [vmem:[#allocation5 + $0x3c8] ss:$16 sps:$4 sm:$0xff]   ;;  %v3322_v62 = vld [vmem:[#allocation5 + $0x1ac] ss:$16 sps:$4 sm:$0xff]  }
  0xb0   :  { %1813 = vmatprep.subr.bf16.mxu1 %v3241_v63  ;;  %v3325_v63 = vld [vmem:[#allocation5 + $0x3ac] ss:$16 sps:$4 sm:$0xff]  }
  0xb2   :  { %1773 = vmatpush2.bf16.msra.mxu0 %v3236_v0  ;;  %v3320_v0 = vld [vmem:[#allocation5 + $0x1a8] ss:$16 sps:$4 sm:$0xff]  }
  0xb3   :  { %1814 = vmatpush2.bf16.msra.mxu1 %v3239_v1  ;;  %1774 = vmatprep.subr.bf16.mxu0 %v3244_v2  ;;  %v3323_v1 = vld [vmem:[#allocation5 + $0x3a8] ss:$16 sps:$4 sm:$0xff]   ;;  %v3328_v2 = vld [vmem:[#allocation5 + $0x18c] ss:$16 sps:$4 sm:$0xff]  }
  0xb4   :  { %1815 = vmatprep.subr.bf16.mxu1 %v3247_v3  ;;  %v3331_v3 = vld [vmem:[#allocation5 + $0x38c] ss:$16 sps:$4 sm:$0xff]  }
  0xb6   :  { %1775 = vmatpush2.bf16.msra.mxu0 %v3242_v4  ;;  %v3326_v4 = vld [vmem:[#allocation5 + $0x188] ss:$16 sps:$4 sm:$0xff]  }
  0xb7   :  { %1816 = vmatpush2.bf16.msra.mxu1 %v3245_v5  ;;  %1776 = vmatprep.subr.bf16.mxu0 %v3250_v6  ;;  %v3329_v5 = vld [vmem:[#allocation5 + $0x388] ss:$16 sps:$4 sm:$0xff]   ;;  %v3334_v6 = vld [vmem:[#allocation5 + $0x16c] ss:$16 sps:$4 sm:$0xff]  }
  0xb8   :  { %1817 = vmatprep.subr.bf16.mxu1 %v3253_v7  ;;  %v3337_v7 = vld [vmem:[#allocation5 + $0x36c] ss:$16 sps:$4 sm:$0xff]  }
  0xba   :  { %1777 = vmatpush2.bf16.msra.mxu0 %v3248_v10  ;;  %v3332_v10 = vld [vmem:[#allocation5 + $0x168] ss:$16 sps:$4 sm:$0xff]  }
  0xbb   :  { %1818 = vmatpush2.bf16.msra.mxu1 %v3251_v11  ;;  %1778 = vmatprep.subr.bf16.mxu0 %v3256_v12  ;;  %v3335_v11 = vld [vmem:[#allocation5 + $0x368] ss:$16 sps:$4 sm:$0xff]   ;;  %v3340_v12 = vld [vmem:[#allocation5 + $0x14c] ss:$16 sps:$4 sm:$0xff]  }
  0xbc   :  { %1819 = vmatprep.subr.bf16.mxu1 %v3259_v13  ;;  %v3343_v13 = vld [vmem:[#allocation5 + $0x34c] ss:$16 sps:$4 sm:$0xff]  }
  0xbe   :  { %1779 = vmatpush2.bf16.msra.mxu0 %v3254_v14  ;;  %v3338_v14 = vld [vmem:[#allocation5 + $0x148] ss:$16 sps:$4 sm:$0xff]  }
  0xbf   :  { %1820 = vmatpush2.bf16.msra.mxu1 %v3257_v15  ;;  %1830 = vmatprep.subr.bf16.mxu0 %v3262_v18  ;;  %v3341_v15 = vld [vmem:[#allocation5 + $0x348] ss:$16 sps:$4 sm:$0xff]  }
  0xc0   :  { %1871 = vmatprep.subr.bf16.mxu1 %v3265_v19  ;;  %v3344_v18 = vld [vmem:[#allocation5 + $0x128] ss:$16 sps:$4 sm:$0xff]  }
  0xc1   :  { %1781 = vmatmul.mubr.bf16.vlgmr.msra.gmra.mxu0 %v3781_v20  ;;  %v3347_v19 = vld [vmem:[#allocation5 + $0x328] ss:$16 sps:$4 sm:$0xff]  }
  0xc2   :  { %1822 = vmatmul.mubr.bf16.vlgmr.msra.gmra.mxu1 %v3783_v21  ;;  %1831 = vmatpush1.bf16.msra.mxu0 %v3260_v22  ;;  %v3352_v22 = vld [vmem:[#allocation5 + $0x10c] ss:$16 sps:$4 sm:$0xff]  }
  0xc3   :  { %1872 = vmatpush1.bf16.msra.mxu1 %v3263_v23  ;;  %1832 = vmatprep.subr.bf16.mxu0 %v3268_v24  ;;  %v3355_v23 = vld [vmem:[#allocation5 + $0x30c] ss:$16 sps:$4 sm:$0xff]   ;;  %v3350_v24 = vld [vmem:[#allocation5 + $0x108] ss:$16 sps:$4 sm:$0xff]  }
  0xc4   :  { %1873 = vmatprep.subr.bf16.mxu1 %v3271_v25  ;;  %1862 = vmatprep.mubr.bf16.mxu0 %v3763_v49  ;;  %v3287_v49 = vld [vmem:[#allocation5 + $0x268] ss:$16 sps:$4 sm:$0xff]  }
  0xc5   :  { %1903 = vmatprep.mubr.bf16.mxu1 %v3765_v52  ;;  %v3292_v52 = vld [vmem:[#allocation5 + $0x4c] ss:$16 sps:$4 sm:$0xff]   ;;  %v3353_v25 = vld [vmem:[#allocation5 + $0x308] ss:$16 sps:$4 sm:$0xff]  }
  0xc6   :  { %1833 = vmatpush1.bf16.msra.mxu0 %v3266_v26  ;;  %v3358_v26 = vld [vmem:[#allocation5 + $0x4ec] ss:$16 sps:$4 sm:$0xff]  }
  0xc7   :  { %1874 = vmatpush1.bf16.msra.mxu1 %v3269_v27  ;;  %1834 = vmatprep.subr.bf16.mxu0 %v3274_v28  ;;  %v3361_v27 = vld [vmem:[#allocation5 + $0x6ec] ss:$16 sps:$4 sm:$0xff]   ;;  %v3356_v28 = vld [vmem:[#allocation5 + $0x4e8] ss:$16 sps:$4 sm:$0xff]  }
  0xc8   :  { %1875 = vmatprep.subr.bf16.mxu1 %v3277_v29  ;;  %v3359_v29 = vld [vmem:[#allocation5 + $0x6e8] ss:$16 sps:$4 sm:$0xff]  }
  0xca   :  { %1835 = vmatpush1.bf16.msra.mxu0 %v3272_v30  ;;  %v3364_v30 = vld [vmem:[#allocation5 + $0x4cc] ss:$16 sps:$4 sm:$0xff]  }
  0xcb   :  { %1876 = vmatpush1.bf16.msra.mxu1 %v3275_v31  ;;  %1836 = vmatprep.subr.bf16.mxu0 %v3280_v32  ;;  %v3367_v31 = vld [vmem:[#allocation5 + $0x6cc] ss:$16 sps:$4 sm:$0xff]   ;;  %v3362_v32 = vld [vmem:[#allocation5 + $0x4c8] ss:$16 sps:$4 sm:$0xff]  }
  0xcc   :  { %1877 = vmatprep.subr.bf16.mxu1 %v3283_v33  ;;  %v3365_v33 = vld [vmem:[#allocation5 + $0x6c8] ss:$16 sps:$4 sm:$0xff]  }
  0xce   :  { %1837 = vmatpush1.bf16.msra.mxu0 %v3278_v34  ;;  %v3370_v34 = vld [vmem:[#allocation5 + $0x4ac] ss:$16 sps:$4 sm:$0xff]  }
  0xcf   :  { %1878 = vmatpush1.bf16.msra.mxu1 %v3281_v35  ;;  %1838 = vmatprep.subr.bf16.mxu0 %v3286_v36  ;;  %v3373_v35 = vld [vmem:[#allocation5 + $0x6ac] ss:$16 sps:$4 sm:$0xff]   ;;  %v3368_v36 = vld [vmem:[#allocation5 + $0x4a8] ss:$16 sps:$4 sm:$0xff]  }
  0xd0   :  { %1879 = vmatprep.subr.bf16.mxu1 %v3289_v38  ;;  %v3371_v38 = vld [vmem:[#allocation5 + $0x6a8] ss:$16 sps:$4 sm:$0xff]  }
  0xd2   :  { %1839 = vmatpush1.bf16.msra.mxu0 %v3284_v39  ;;  %v3376_v39 = vld [vmem:[#allocation5 + $0x48c] ss:$16 sps:$4 sm:$0xff]  }
  0xd3   :  { %1880 = vmatpush1.bf16.msra.mxu1 %v3287_v49  ;;  %1840 = vmatprep.subr.bf16.mxu0 %v3292_v52  ;;  %v3379_v49 = vld [vmem:[#allocation5 + $0x68c] ss:$16 sps:$4 sm:$0xff]  }
  0xd4   :  { %1881 = vmatprep.subr.bf16.mxu1 %v3295_v41  ;;  %v3382_v52 = vld [vmem:[#allocation5 + $0x46c] ss:$16 sps:$4 sm:$0xff]  }
  0xd5   :  { %v3385_v41 = vld [vmem:[#allocation5 + $0x66c] ss:$16 sps:$4 sm:$0xff]  }
  0xd6   :  { %1841 = vmatpush1.bf16.msra.mxu0 %v3290_v42  ;;  %v3380_v42 = vld [vmem:[#allocation5 + $0x468] ss:$16 sps:$4 sm:$0xff]  }
  0xd7   :  { %1882 = vmatpush1.bf16.msra.mxu1 %v3293_v43  ;;  %1842 = vmatprep.subr.bf16.mxu0 %v3298_v44  ;;  %v3383_v43 = vld [vmem:[#allocation5 + $0x668] ss:$16 sps:$4 sm:$0xff]   ;;  %v3388_v44 = vld [vmem:[#allocation5 + $0x44c] ss:$16 sps:$4 sm:$0xff]  }
  0xd8   :  { %1883 = vmatprep.subr.bf16.mxu1 %v3301_v45  ;;  %v3389_v45 = vld [vmem:[#allocation5 + $0x648] ss:$16 sps:$4 sm:$0xff]  }
  0xda   :  { %1843 = vmatpush1.bf16.msra.mxu0 %v3296_v46  ;;  %v3394_v46 = vld [vmem:[#allocation5 + $0x42c] ss:$16 sps:$4 sm:$0xff]  }
  0xdb   :  { %1884 = vmatpush1.bf16.msra.mxu1 %v3299_v47  ;;  %1844 = vmatprep.subr.bf16.mxu0 %v3304_v48  ;;  %v3397_v47 = vld [vmem:[#allocation5 + $0x62c] ss:$16 sps:$4 sm:$0xff]   ;;  %v3392_v48 = vld [vmem:[#allocation5 + $0x428] ss:$16 sps:$4 sm:$0xff]  }
  0xdc   :  { %1885 = vmatprep.subr.bf16.mxu1 %v3307_v50  ;;  %v3395_v50 = vld [vmem:[#allocation5 + $0x628] ss:$16 sps:$4 sm:$0xff]  }
  0xde   :  { %1845 = vmatpush1.bf16.msra.mxu0 %v3302_v51  ;;  %v3400_v51 = vld [vmem:[#allocation5 + $0x40c] ss:$16 sps:$4 sm:$0xff]  }
  0xdf   :  { %1886 = vmatpush1.bf16.msra.mxu1 %v3305_v53  ;;  %1846 = vmatprep.subr.bf16.mxu0 %v3310_v54  ;;  %v3403_v53 = vld [vmem:[#allocation5 + $0x60c] ss:$16 sps:$4 sm:$0xff]   ;;  %v3398_v54 = vld [vmem:[#allocation5 + $0x408] ss:$16 sps:$4 sm:$0xff]  }
  0xe0   :  { %1887 = vmatprep.subr.bf16.mxu1 %v3313_v55  ;;  %v3401_v55 = vld [vmem:[#allocation5 + $0x608] ss:$16 sps:$4 sm:$0xff]  }
  0xe2   :  { %1847 = vmatpush2.bf16.msra.mxu0 %v3308_v56  ;;  %v3406_v56 = vld [vmem:[#allocation5 + $0x5ec] ss:$16 sps:$4 sm:$0xff]  }
  0xe3   :  { %1888 = vmatpush2.bf16.msra.mxu1 %v3311_v57  ;;  %1848 = vmatprep.subr.bf16.mxu0 %v3316_v58  ;;  %v3409_v57 = vld [vmem:[#allocation5 + $0x7ec] ss:$16 sps:$4 sm:$0xff]   ;;  %v3404_v58 = vld [vmem:[#allocation5 + $0x5e8] ss:$16 sps:$4 sm:$0xff]  }
  0xe4   :  { %1889 = vmatprep.subr.bf16.mxu1 %v3319_v59  ;;  %v3407_v59 = vld [vmem:[#allocation5 + $0x7e8] ss:$16 sps:$4 sm:$0xff]  }
  0xe6   :  { %1849 = vmatpush2.bf16.msra.mxu0 %v3314_v60  ;;  %v3412_v60 = vld [vmem:[#allocation5 + $0x5cc] ss:$16 sps:$4 sm:$0xff]  }
  0xe7   :  { %1890 = vmatpush2.bf16.msra.mxu1 %v3317_v61  ;;  %1850 = vmatprep.subr.bf16.mxu0 %v3322_v62  ;;  %v3415_v61 = vld [vmem:[#allocation5 + $0x7cc] ss:$16 sps:$4 sm:$0xff]   ;;  %v3410_v62 = vld [vmem:[#allocation5 + $0x5c8] ss:$16 sps:$4 sm:$0xff]  }
  0xe8   :  { %1891 = vmatprep.subr.bf16.mxu1 %v3325_v63  ;;  %v3413_v63 = vld [vmem:[#allocation5 + $0x7c8] ss:$16 sps:$4 sm:$0xff]  }
  0xea   :  { %1851 = vmatpush2.bf16.msra.mxu0 %v3320_v0  ;;  %v3418_v0 = vld [vmem:[#allocation5 + $0x5ac] ss:$16 sps:$4 sm:$0xff]  }
  0xeb   :  { %1892 = vmatpush2.bf16.msra.mxu1 %v3323_v1  ;;  %1852 = vmatprep.subr.bf16.mxu0 %v3328_v2  ;;  %v3421_v1 = vld [vmem:[#allocation5 + $0x7ac] ss:$16 sps:$4 sm:$0xff]   ;;  %v3416_v2 = vld [vmem:[#allocation5 + $0x5a8] ss:$16 sps:$4 sm:$0xff]  }
  0xec   :  { %1893 = vmatprep.subr.bf16.mxu1 %v3331_v3  ;;  %v3419_v3 = vld [vmem:[#allocation5 + $0x7a8] ss:$16 sps:$4 sm:$0xff]  }
  0xee   :  { %1853 = vmatpush2.bf16.msra.mxu0 %v3326_v4  ;;  %v3424_v4 = vld [vmem:[#allocation5 + $0x58c] ss:$16 sps:$4 sm:$0xff]  }
  0xef   :  { %1894 = vmatpush2.bf16.msra.mxu1 %v3329_v5  ;;  %1854 = vmatprep.subr.bf16.mxu0 %v3334_v6  ;;  %v3427_v5 = vld [vmem:[#allocation5 + $0x78c] ss:$16 sps:$4 sm:$0xff]   ;;  %v3422_v6 = vld [vmem:[#allocation5 + $0x588] ss:$16 sps:$4 sm:$0xff]  }
  0xf0   :  { %1895 = vmatprep.subr.bf16.mxu1 %v3337_v7  ;;  %v3425_v7 = vld [vmem:[#allocation5 + $0x788] ss:$16 sps:$4 sm:$0xff]  }
  0xf2   :  { %1855 = vmatpush2.bf16.msra.mxu0 %v3332_v10  ;;  %v3430_v10 = vld [vmem:[#allocation5 + $0x56c] ss:$16 sps:$4 sm:$0xff]  }
  0xf3   :  { %1896 = vmatpush2.bf16.msra.mxu1 %v3335_v11  ;;  %1856 = vmatprep.subr.bf16.mxu0 %v3340_v12  ;;  %v3433_v11 = vld [vmem:[#allocation5 + $0x76c] ss:$16 sps:$4 sm:$0xff]   ;;  %v3428_v12 = vld [vmem:[#allocation5 + $0x568] ss:$16 sps:$4 sm:$0xff]  }
  0xf4   :  { %1897 = vmatprep.subr.bf16.mxu1 %v3343_v13  ;;  %v3431_v13 = vld [vmem:[#allocation5 + $0x768] ss:$16 sps:$4 sm:$0xff]  }
  0xf6   :  { %1857 = vmatpush2.bf16.msra.mxu0 %v3338_v14  ;;  %v3436_v14 = vld [vmem:[#allocation5 + $0x54c] ss:$16 sps:$4 sm:$0xff]  }
  0xf7   :  { %1898 = vmatpush2.bf16.msra.mxu1 %v3341_v15  ;;  %1858 = vmatprep.subr.bf16.mxu0 %v3346_v16  ;;  %v3439_v15 = vld [vmem:[#allocation5 + $0x74c] ss:$16 sps:$4 sm:$0xff]   ;;  %v3434_v16 = vld [vmem:[#allocation5 + $0x548] ss:$16 sps:$4 sm:$0xff]  }
  0xf8   :  { %1899 = vmatprep.subr.bf16.mxu1 %v3349_v17  ;;  %v3437_v17 = vld [vmem:[#allocation5 + $0x748] ss:$16 sps:$4 sm:$0xff]  }
  0xfa   :  { %1859 = vmatpush2.bf16.msra.mxu0 %v3344_v18  ;;  %v3442_v18 = vld [vmem:[#allocation5 + $0x52c] ss:$16 sps:$4 sm:$0xff]  }
  0xfb   :  { %1900 = vmatpush2.bf16.msra.mxu1 %v3347_v19  ;;  %1860 = vmatprep.subr.bf16.mxu0 %v3352_v22  ;;  %v3445_v19 = vld [vmem:[#allocation5 + $0x72c] ss:$16 sps:$4 sm:$0xff]   ;;  %v3440_v22 = vld [vmem:[#allocation5 + $0x528] ss:$16 sps:$4 sm:$0xff]  }
  0xfc   :  { %1901 = vmatprep.subr.bf16.mxu1 %v3355_v23  ;;  %v3443_v23 = vld [vmem:[#allocation5 + $0x728] ss:$16 sps:$4 sm:$0xff]  }
  0xfe   :  { %1861 = vmatpush2.bf16.msra.mxu0 %v3350_v24  ;;  %v3448_v24 = vld [vmem:[#allocation5 + $0x50c] ss:$16 sps:$4 sm:$0xff]  }
  0xff   :  { %1902 = vmatpush2.bf16.msra.mxu1 %v3353_v25  ;;  %1912 = vmatprep.subr.bf16.mxu0 %v3358_v26  ;;  %v3451_v25 = vld [vmem:[#allocation5 + $0x70c] ss:$16 sps:$4 sm:$0xff]   ;;  %v3446_v26 = vld [vmem:[#allocation5 + $0x508] ss:$16 sps:$4 sm:$0xff]  }
 0x100   :  { %1953 = vmatprep.subr.bf16.mxu1 %v3361_v27  ;;  %v3449_v27 = vld [vmem:[#allocation5 + $0x708] ss:$16 sps:$4 sm:$0xff]  }
 0x101   :  { %1863 = vmatmul.mubr.bf16.vlgmr.msra.gmra.mxu0 %v3769_v8  ;;  %v3374_v8 = vld [vmem:[#allocation5 + $0x488] ss:$16 sps:$4 sm:$0xff]  }
 0x102   :  { %1904 = vmatmul.mubr.bf16.vlgmr.msra.gmra.mxu1 %v3771_v9  ;;  %1913 = vmatpush1.bf16.msra.mxu0 %v3356_v28  ;;  %v3377_v9 = vld [vmem:[#allocation5 + $0x688] ss:$16 sps:$4 sm:$0xff]  }
 0x103   :  { %1954 = vmatpush1.bf16.msra.mxu1 %v3359_v29  ;;  %1914 = vmatprep.subr.bf16.mxu0 %v3364_v30  ;;  %v3454_v28 = vld [vmem:[#allocation8 + $0x74] ss:$8 sps:$4 sm:$0xff]   ;;  %v3452_v29 = vld [vmem:[#allocation8 + $0x70] ss:$8 sps:$4 sm:$0xff]   ;;  %v3457_v30 = vld [vmem:[#allocation8 + $0x64] ss:$8 sps:$4 sm:$0xff]  }
 0x104   :  { %1955 = vmatprep.subr.bf16.mxu1 %v3367_v31  ;;  %1944 = vmatprep.mubr.bf16.mxu0 %v3775_v37  ;;  %v3391_v37 = vld [vmem:[#allocation5 + $0x64c] ss:$16 sps:$4 sm:$0xff]  }
 0x105   :  { %1985 = vmatprep.mubr.bf16.mxu1 %v3777_v40  ;;  %v3386_v40 = vld [vmem:[#allocation5 + $0x448] ss:$16 sps:$4 sm:$0xff]  }
 0x106   :  { %1915 = vmatpush1.bf16.msra.mxu0 %v3362_v32 }
 0x107   :  { %1956 = vmatpush1.bf16.msra.mxu1 %v3365_v33  ;;  %1916 = vmatprep.subr.bf16.mxu0 %v3370_v34  ;;  %v3455_v33 = vld [vmem:[#allocation8 + $0x60] ss:$8 sps:$4 sm:$0xff]  }
 0x108   :  { %1957 = vmatprep.subr.bf16.mxu1 %v3373_v35 }
 0x10a   :  { %1917 = vmatpush1.bf16.msra.mxu0 %v3368_v36  ;;  %v3460_v36 = vld [vmem:[#allocation8 + $0x54] ss:$8 sps:$4 sm:$0xff]  }
 0x10b   :  { %1958 = vmatpush1.bf16.msra.mxu1 %v3371_v38  ;;  %1918 = vmatprep.subr.bf16.mxu0 %v3376_v39 }
 0x10c   :  { %1959 = vmatprep.subr.bf16.mxu1 %v3379_v49  ;;  %v3458_v49 = vld [vmem:[#allocation8 + $0x50] ss:$8 sps:$4 sm:$0xff]  }
 0x10e   :  { %1919 = vmatpush1.bf16.msra.mxu0 %v3374_v8 }
 0x10f   :  { %1960 = vmatpush1.bf16.msra.mxu1 %v3377_v9  ;;  %1920 = vmatprep.subr.bf16.mxu0 %v3382_v52  ;;  %v3463_v52 = vld [vmem:[#allocation8 + $0x44] ss:$8 sps:$4 sm:$0xff]  }
 0x110   :  { %1961 = vmatprep.subr.bf16.mxu1 %v3385_v41  ;;  %v3500_v41 = vld [vmem:[#allocation8 + $0x170] ss:$8 sps:$4 sm:$0xff]  }
 0x112   :  { %1921 = vmatpush1.bf16.msra.mxu0 %v3380_v42  ;;  %v3505_v42 = vld [vmem:[#allocation8 + $0x164] ss:$8 sps:$4 sm:$0xff]  }
 0x113   :  { %1962 = vmatpush1.bf16.msra.mxu1 %v3383_v43  ;;  %1922 = vmatprep.subr.bf16.mxu0 %v3388_v44  ;;  %v3503_v43 = vld [vmem:[#allocation8 + $0x160] ss:$8 sps:$4 sm:$0xff]   ;;  %v3466_v44 = vld [vmem:[#allocation8 + $0x34] ss:$8 sps:$4 sm:$0xff]  }
 0x114   :  { %1963 = vmatprep.subr.bf16.mxu1 %v3391_v37  ;;  %v3508_v37 = vld [vmem:[#allocation8 + $0x154] ss:$8 sps:$4 sm:$0xff]  }
 0x116   :  { %1923 = vmatpush1.bf16.msra.mxu0 %v3386_v40  ;;  %v3464_v40 = vld [vmem:[#allocation8 + $0x30] ss:$8 sps:$4 sm:$0xff]  }
 0x117   :  { %1964 = vmatpush1.bf16.msra.mxu1 %v3389_v45  ;;  %1924 = vmatprep.subr.bf16.mxu0 %v3394_v46  ;;  %v3506_v45 = vld [vmem:[#allocation8 + $0x150] ss:$8 sps:$4 sm:$0xff]   ;;  %v3469_v46 = vld [vmem:[#allocation8 + $0x24] ss:$8 sps:$4 sm:$0xff]  }
 0x118   :  { %1965 = vmatprep.subr.bf16.mxu1 %v3397_v47  ;;  %v3511_v47 = vld [vmem:[#allocation8 + $0x144] ss:$8 sps:$4 sm:$0xff]  }
 0x11a   :  { %1925 = vmatpush1.bf16.msra.mxu0 %v3392_v48  ;;  %v3467_v48 = vld [vmem:[#allocation8 + $0x20] ss:$8 sps:$4 sm:$0xff]  }
 0x11b   :  { %1966 = vmatpush1.bf16.msra.mxu1 %v3395_v50  ;;  %1926 = vmatprep.subr.bf16.mxu0 %v3400_v51  ;;  %v3509_v50 = vld [vmem:[#allocation8 + $0x140] ss:$8 sps:$4 sm:$0xff]   ;;  %v3472_v51 = vld [vmem:[#allocation8 + $0x14] ss:$8 sps:$4 sm:$0xff]  }
 0x11c   :  { %1967 = vmatprep.subr.bf16.mxu1 %v3403_v53  ;;  %v3514_v53 = vld [vmem:[#allocation8 + $0x134] ss:$8 sps:$4 sm:$0xff]  }
 0x11e   :  { %1927 = vmatpush1.bf16.msra.mxu0 %v3398_v54  ;;  %v3470_v54 = vld [vmem:[#allocation8 + $0x10] ss:$8 sps:$4 sm:$0xff]  }
 0x11f   :  { %1968 = vmatpush1.bf16.msra.mxu1 %v3401_v55  ;;  %1928 = vmatprep.subr.bf16.mxu0 %v3406_v56  ;;  %v3512_v55 = vld [vmem:[#allocation8 + $0x130] ss:$8 sps:$4 sm:$0xff]   ;;  %v3475_v56 = vld [vmem:[#allocation8 + $0x4] ss:$8 sps:$4 sm:$0xff]  }
 0x120   :  { %1969 = vmatprep.subr.bf16.mxu1 %v3409_v57  ;;  %v3517_v57 = vld [vmem:[#allocation8 + $0x124] ss:$8 sps:$4 sm:$0xff]  }
 0x122   :  { %1929 = vmatpush2.bf16.msra.mxu0 %v3404_v58  ;;  %v3473_v58 = vld [vmem:[#allocation8] ss:$8 sps:$4 sm:$0xff]  }
 0x123   :  { %1970 = vmatpush2.bf16.msra.mxu1 %v3407_v59  ;;  %1930 = vmatprep.subr.bf16.mxu0 %v3412_v60  ;;  %v3515_v59 = vld [vmem:[#allocation8 + $0x120] ss:$8 sps:$4 sm:$0xff]   ;;  %v3478_v60 = vld [vmem:[#allocation8 + $0xf4] ss:$8 sps:$4 sm:$0xff]  }
 0x124   :  { %1971 = vmatprep.subr.bf16.mxu1 %v3415_v61  ;;  %v3520_v61 = vld [vmem:[#allocation8 + $0x114] ss:$8 sps:$4 sm:$0xff]  }
 0x126   :  { %1931 = vmatpush2.bf16.msra.mxu0 %v3410_v62  ;;  %v3476_v62 = vld [vmem:[#allocation8 + $0xf0] ss:$8 sps:$4 sm:$0xff]  }
 0x127   :  { %1972 = vmatpush2.bf16.msra.mxu1 %v3413_v63  ;;  %1932 = vmatprep.subr.bf16.mxu0 %v3418_v0  ;;  %v3518_v63 = vld [vmem:[#allocation8 + $0x110] ss:$8 sps:$4 sm:$0xff]   ;;  %v3481_v0 = vld [vmem:[#allocation8 + $0xe4] ss:$8 sps:$4 sm:$0xff]  }
 0x128   :  { %1973 = vmatprep.subr.bf16.mxu1 %v3421_v1  ;;  %v3523_v1 = vld [vmem:[#allocation8 + $0x104] ss:$8 sps:$4 sm:$0xff]  }
 0x12a   :  { %1933 = vmatpush2.bf16.msra.mxu0 %v3416_v2  ;;  %v3479_v2 = vld [vmem:[#allocation8 + $0xe0] ss:$8 sps:$4 sm:$0xff]  }
 0x12b   :  { %1974 = vmatpush2.bf16.msra.mxu1 %v3419_v3  ;;  %1934 = vmatprep.subr.bf16.mxu0 %v3424_v4  ;;  %v3521_v3 = vld [vmem:[#allocation8 + $0x100] ss:$8 sps:$4 sm:$0xff]   ;;  %v3484_v4 = vld [vmem:[#allocation8 + $0xd4] ss:$8 sps:$4 sm:$0xff]  }
 0x12c   :  { %1975 = vmatprep.subr.bf16.mxu1 %v3427_v5  ;;  %v3526_v5 = vld [vmem:[#allocation8 + $0x1f4] ss:$8 sps:$4 sm:$0xff]  }
 0x12e   :  { %1935 = vmatpush2.bf16.msra.mxu0 %v3422_v6  ;;  %v3482_v6 = vld [vmem:[#allocation8 + $0xd0] ss:$8 sps:$4 sm:$0xff]  }
 0x12f   :  { %1976 = vmatpush2.bf16.msra.mxu1 %v3425_v7  ;;  %1936 = vmatprep.subr.bf16.mxu0 %v3430_v10  ;;  %v3524_v7 = vld [vmem:[#allocation8 + $0x1f0] ss:$8 sps:$4 sm:$0xff]   ;;  %v3487_v10 = vld [vmem:[#allocation8 + $0xc4] ss:$8 sps:$4 sm:$0xff]  }
 0x130   :  { %1977 = vmatprep.subr.bf16.mxu1 %v3433_v11  ;;  %v3529_v11 = vld [vmem:[#allocation8 + $0x1e4] ss:$8 sps:$4 sm:$0xff]  }
 0x132   :  { %1937 = vmatpush2.bf16.msra.mxu0 %v3428_v12  ;;  %v3485_v12 = vld [vmem:[#allocation8 + $0xc0] ss:$8 sps:$4 sm:$0xff]  }
 0x133   :  { %1978 = vmatpush2.bf16.msra.mxu1 %v3431_v13  ;;  %1938 = vmatprep.subr.bf16.mxu0 %v3436_v14  ;;  %v3527_v13 = vld [vmem:[#allocation8 + $0x1e0] ss:$8 sps:$4 sm:$0xff]   ;;  %v3490_v14 = vld [vmem:[#allocation8 + $0xb4] ss:$8 sps:$4 sm:$0xff]  }
 0x134   :  { %1979 = vmatprep.subr.bf16.mxu1 %v3439_v15  ;;  %v3532_v15 = vld [vmem:[#allocation8 + $0x1d4] ss:$8 sps:$4 sm:$0xff]  }
 0x136   :  { %1939 = vmatpush2.bf16.msra.mxu0 %v3434_v16  ;;  %v366_v16 = vlaneseq }
 0x137   :  { %1980 = vmatpush2.bf16.msra.mxu1 %v3437_v17  ;;  %1940 = vmatprep.subr.bf16.mxu0 %v3442_v18  ;;  %v3488_v17 = vld [vmem:[#allocation8 + $0xb0] ss:$8 sps:$4 sm:$0xff]  }
 0x138   :  { %1981 = vmatprep.subr.bf16.mxu1 %v3445_v19  ;;  %v3530_v18 = vld [vmem:[#allocation8 + $0x1d0] ss:$8 sps:$4 sm:$0xff]   ;;  %v3493_v19 = vld [vmem:[#allocation8 + $0xa4] ss:$8 sps:$4 sm:$0xff]  }
 0x13a   :  { %1941 = vmatpush2.bf16.msra.mxu0 %v3440_v22  ;;  %v3535_v22 = vld [vmem:[#allocation8 + $0x1c4] ss:$8 sps:$4 sm:$0xff]  }
 0x13b   :  { %1982 = vmatpush2.bf16.msra.mxu1 %v3443_v23  ;;  %1942 = vmatprep.subr.bf16.mxu0 %v3448_v24  ;;  %v3803_v23 = vshrl.u32 %v366_v16, 7  ;;  %v3491_v24 = vld [vmem:[#allocation8 + $0xa0] ss:$8 sps:$4 sm:$0xff]   ;;  %v3557_v16 = vld [vmem:[#allocation10 + $0x18] sm:$0xff]  }
 0x13c   :  { %1983 = vmatprep.subr.bf16.mxu1 %v3451_v25  ;;  %v3533_v25 = vld [vmem:[#allocation8 + $0x1c0] ss:$8 sps:$4 sm:$0xff]  }
 0x13e   :  { %1943 = vmatpush2.bf16.msra.mxu0 %v3446_v26  ;;  %v3496_v26 = vld [vmem:[#allocation8 + $0x94] ss:$8 sps:$4 sm:$0xff]  }
 0x13f   :  { %1984 = vmatpush2.bf16.msra.mxu1 %v3449_v27  ;;  %2406 = vmatprep.subr.bf16.mxu0 %v3454_v28  ;;  %v3538_v27 = vld [vmem:[#allocation8 + $0x1b4] ss:$8 sps:$4 sm:$0xff]   ;;  %v368_v28 = vsub.s32 0, %v3803_v23 }
 0x141   :  { %v3793_v31 = vpop.f32.mrf.mxu0  ;;  %1945 = vmatmul.mubr.bf16.vlgmr.msra.gmra.mxu0 %v3781_v20  ;;  %v3502_v20 = vld [vmem:[#allocation8 + $0x174] ss:$8 sps:$4 sm:$0xff]  }
 0x142   :  { %v3795_v32 = vpop.f32.mrf.mxu1  ;;  %1986 = vmatmul.mubr.bf16.vlgmr.msra.gmra.mxu1 %v3783_v21  ;;  %2407 = vmatpush1.bf16.msra.mxu0 %v3452_v29  ;;  %v3461_v21 = vld [vmem:[#allocation8 + $0x40] ss:$8 sps:$4 sm:$0xff]   ;;  %v3806_v29 = vld [vmem:[#allocation7] sm:$0xf] }
 0x143   :  { %v3799_v34 = vpop.f32.mrf.mxu0  ;;  %2408 = vmatprep.subr.bf16.mxu0 %v3457_v30  ;;  %2447 = vmatprep.subr.bf16.mxu1 %v3502_v20  ;;  %v372_v30 = vsub.s32 1, %v3803_v23  ;;  %v3541_v20 = vld [vmem:[#allocation8 + $0x1a4] ss:$8 sps:$4 sm:$0xff]  }
 0x144   :  { %v3801_v35 = vpop.f32.mrf.mxu1  ;;  %2448 = vmatpush1.bf16.msra.mxu1 %v3500_v41 }
 0x145   :  { %v1704_v38 = vpop.f32.mrf.mxu0  ;;  %2449 = vmatprep.subr.bf16.mxu1 %v3505_v42 }
 0x146   :  { %v1745_v39 = vpop.f32.mrf.mxu1  ;;  %2409 = vmatpush1.bf16.msra.mxu0 %v3455_v33  ;;  %v3494_v33 = vld [vmem:[#allocation8 + $0x90] ss:$8 sps:$4 sm:$0xff]   ;;  %v3499_v38 = vld [vmem:[#allocation8 + $0x84] ss:$8 sps:$4 sm:$0xff]  }
 0x147   :  { %v1705_v8 = vpop.f32.mrf.mxu0  ;;  %2410 = vmatprep.subr.bf16.mxu0 %v3460_v36  ;;  %v3536_v36 = vld [vmem:[#allocation8 + $0x1b0] ss:$8 sps:$4 sm:$0xff]   ;;  %v369_v39 = vrot.slane %v3806_v29, %v368_v28 }
 0x148   :  { %v1746_v9 = vpop.f32.mrf.mxu1  ;;  %2450 = vmatpush1.bf16.msra.mxu1 %v3503_v43  ;;  %v3497_v8 = vld [vmem:[#allocation8 + $0x80] ss:$8 sps:$4 sm:$0xff]  }
 0x149   :  { %2451 = vmatprep.subr.bf16.mxu1 %v3508_v37  ;;  %v1701_v9 = vadd.f32 %v3793_v31, %v369_v39  ;;  %v3539_v43 = vld [vmem:[#allocation8 + $0x1a0] ss:$8 sps:$4 sm:$0xff]  }
 0x14a   :  { %2411 = vmatpush1.bf16.msra.mxu0 %v3458_v49  ;;  %v373_v49 = vrot.slane %v3806_v29, %v372_v30 }
 0x14b   :  { %2412 = vmatprep.subr.bf16.mxu0 %v3463_v52  ;;  %v1742_v41 = vadd.f32 %v3795_v32, %v1701_v9 }
 0x14c   :  { %2452 = vmatpush1.bf16.msra.mxu1 %v3506_v45  ;;  %v1703_v52 = vadd.f32 %v3799_v34, %v373_v49  ;;  %v3542_v34 = vld [vmem:[#allocation8 + $0x190] ss:$8 sps:$4 sm:$0xff]  }
 0x14d   :  { %2453 = vmatprep.subr.bf16.mxu1 %v3511_v47 }
 0x14e   :  { %2413 = vmatpush1.bf16.msra.mxu0 %v3461_v21 }
 0x14f   :  { %2414 = vmatprep.subr.bf16.mxu0 %v3466_v44  ;;  %v1744_v44 = vadd.f32 %v3801_v35, %v1703_v52 }
 0x150   :  { %2454 = vmatpush1.bf16.msra.mxu1 %v3509_v50 }
 0x151   :  { %2455 = vmatprep.subr.bf16.mxu1 %v3514_v53 }
 0x152   :  { %2415 = vmatpush1.bf16.msra.mxu0 %v3464_v40 }
 0x153   :  { %2416 = vmatprep.subr.bf16.mxu0 %v3469_v46 }
 0x154   :  { %2456 = vmatpush1.bf16.msra.mxu1 %v3512_v55  ;;  %v3547_v55 = vld [vmem:[#allocation8 + $0x184] ss:$8 sps:$4 sm:$0xff]  }
 0x155   :  { %2457 = vmatprep.subr.bf16.mxu1 %v3517_v57  ;;  %v3545_v57 = vld [vmem:[#allocation8 + $0x180] ss:$8 sps:$4 sm:$0xff]  }
 0x156   :  { %2417 = vmatpush1.bf16.msra.mxu0 %v3467_v48  ;;  %v3544_v48 = vld [vmem:[#allocation8 + $0x194] ss:$8 sps:$4 sm:$0xff]  }
 0x157   :  { %2418 = vmatprep.subr.bf16.mxu0 %v3472_v51 }
 0x158   :  { %2458 = vmatpush1.bf16.msra.mxu1 %v3515_v59 }
 0x159   :  { %2459 = vmatprep.subr.bf16.mxu1 %v3520_v61 }
 0x15a   :  { %2419 = vmatpush1.bf16.msra.mxu0 %v3470_v54 }
 0x15b   :  { %2420 = vmatprep.subr.bf16.mxu0 %v3475_v56 }
 0x15c   :  { %2460 = vmatpush1.bf16.msra.mxu1 %v3518_v63 }
 0x15d   :  { %2461 = vmatprep.subr.bf16.mxu1 %v3523_v1 }
 0x15e   :  { %2421 = vmatpush1.bf16.msra.mxu0 %v3473_v58 }
 0x15f   :  { %2422 = vmatprep.subr.bf16.mxu0 %v3478_v60 }
 0x160   :  { %2462 = vmatpush1.bf16.msra.mxu1 %v3521_v3 }
 0x161   :  { %2463 = vmatprep.subr.bf16.mxu1 %v3526_v5  ;;  %v3548_v5 = vld [vmem:[#allocation10 + $0x78] sm:$0xff]  }
 0x162   :  { %2423 = vmatpush2.bf16.msra.mxu0 %v3476_v62 }
 0x163   :  { %2424 = vmatprep.subr.bf16.mxu0 %v3481_v0 }
 0x164   :  { %2464 = vmatpush2.bf16.msra.mxu1 %v3524_v7  ;;  %v3550_v7 = vld [vmem:[#allocation10 + $0x70] sm:$0xff]  }
 0x165   :  { %2465 = vmatprep.subr.bf16.mxu1 %v3529_v11  ;;  %v3552_v11 = vld [vmem:[#allocation10 + $0x68] sm:$0xff]  }
 0x166   :  { %2425 = vmatpush2.bf16.msra.mxu0 %v3479_v2 }
 0x167   :  { %2426 = vmatprep.subr.bf16.mxu0 %v3484_v4 }
 0x168   :  { %2466 = vmatpush2.bf16.msra.mxu1 %v3527_v13  ;;  %v3554_v13 = vld [vmem:[#allocation10 + $0x60] sm:$0xff]  }
 0x169   :  { %2467 = vmatprep.subr.bf16.mxu1 %v3532_v15  ;;  %v3556_v15 = vld [vmem:[#allocation10 + $0x58] sm:$0xff]  }
 0x16a   :  { %2427 = vmatpush2.bf16.msra.mxu0 %v3482_v6  ;;  %v3549_v6 = vld [vmem:[#allocation10 + $0x38] sm:$0xff]  }
 0x16b   :  { %2428 = vmatprep.subr.bf16.mxu0 %v3487_v10  ;;  %v3551_v10 = vld [vmem:[#allocation10 + $0x30] sm:$0xff]  }
 0x16c   :  { %2468 = vmatpush2.bf16.msra.mxu1 %v3530_v18  ;;  %v376_v18 = vsub.s32 2, %v3803_v23 }
 0x16d   :  { %2469 = vmatprep.subr.bf16.mxu1 %v3535_v22 }
 0x16e   :  { %2429 = vmatpush2.bf16.msra.mxu0 %v3485_v12  ;;  %v3553_v12 = vld [vmem:[#allocation10 + $0x28] sm:$0xff]   ;;  %v377_v22 = vrot.slane %v3806_v29, %v376_v18 }
 0x16f   :  { %2430 = vmatprep.subr.bf16.mxu0 %v3490_v14  ;;  %v3555_v14 = vld [vmem:[#allocation10 + $0x20] sm:$0xff]  }
 0x170   :  { %2470 = vmatpush2.bf16.msra.mxu1 %v3533_v25 }
 0x171   :  { %2471 = vmatprep.subr.bf16.mxu1 %v3538_v27 }
 0x172   :  { %2431 = vmatpush2.bf16.msra.mxu0 %v3488_v17  ;;  %v3558_v17 = vld [vmem:[#allocation10 + $0x50] sm:$0xff]  }
 0x173   :  { %2432 = vmatprep.subr.bf16.mxu0 %v3493_v19  ;;  %v380_v19 = vsub.s32 3, %v3803_v23 }
 0x174   :  { %2472 = vmatpush2.bf16.msra.mxu1 %v3536_v36 }
 0x175   :  { %2473 = vmatprep.subr.bf16.mxu1 %v3541_v20 }
 0x176   :  { %2433 = vmatpush2.bf16.msra.mxu0 %v3491_v24  ;;  %v381_v24 = vrot.slane %v3806_v29, %v380_v19 }
 0x177   :  { %2434 = vmatprep.subr.bf16.mxu0 %v3496_v26 }
 0x178   :  { %2474 = vmatpush2.bf16.msra.mxu1 %v3539_v43 }
 0x179   :  { %2475 = vmatprep.subr.bf16.mxu1 %v3544_v48 }
 0x17a   :  { %2435 = vmatpush2.bf16.msra.mxu0 %v3494_v33 }
 0x17b   :  { %2436 = vmatprep.subr.bf16.mxu0 %v3499_v38 }
 0x17c   :  { %2476 = vmatpush2.bf16.msra.mxu1 %v3542_v34  ;;  %v3561_v34 = vld [vmem:[#allocation10 + $0x8] sm:$0xff]  }
 0x17d   :  { %2477 = vmatprep.subr.bf16.mxu1 %v3547_v55 }
 0x17e   :  { %2437 = vmatpush2.bf16.msra.mxu0 %v3497_v8 }
 0x17f   :  { %3034 = vmatprep.subr.bf16.mxu0 %v3548_v5 }
 0x180   :  { %2478 = vmatpush2.bf16.msra.mxu1 %v3545_v57 }
 0x181   :  { %v1782_v42 = vpop.f32.mrf.mxu0 }
 0x182   :  { %v1823_v21 = vpop.f32.mrf.mxu1  ;;  %v1783_v37 = vadd.f32 %v1782_v42, %v1742_v41 }
 0x183   :  { %v1784_v40 = vpop.f32.mrf.mxu0 }
 0x184   :  { %v1825_v45 = vpop.f32.mrf.mxu1  ;;  %v1824_v46 = vadd.f32 %v1823_v21, %v1783_v37  ;;  %v1785_v47 = vadd.f32 %v1784_v40, %v1744_v44 }
 0x185   :  { %v1786_v31 = vpop.f32.mrf.mxu0 }
 0x186   :  { %v1827_v50 = vpop.f32.mrf.mxu1  ;;  %vm1994_vm0 = vcmp.gt.f32.partialorder %v1824_v46, 0.0  ;;  %v1998_v51 = vmul.f32 0.2, %v1824_v46  ;;  %v1826_v32 = vadd.f32 %v1825_v45, %v1785_v47  ;;  %v3559_v47 = vld [vmem:[#allocation10 + $0x10] sm:$0xff]   ;;  %v3560_v31 = vld [vmem:[#allocation10 + $0x48] sm:$0xff]  }
 0x187   :  { %v1787_v53 = vpop.f32.mrf.mxu0 }
 0x188   :  { %v1828_v54 = vpop.f32.mrf.mxu1  ;;  %vm1995_vm1 = vcmp.gt.f32.partialorder %v1826_v32, 0.0  ;;  %v1999_v35 = vmul.f32 0.2, %v1826_v32  ;;  %v2002_v56 = vsel %vm1994_vm0, %v1824_v46, %v1998_v51 }
 0x189   :  { %v2006_v60 = vpack.c.bf16 %v2002_v56, %v2002_v56  ;;  %v3563_v54 = vld [vmem:[#allocation10] sm:$0xff]  }
 0x18a   :  { %v2003_v58 = vsel %vm1995_vm1, %v1826_v32, %v1999_v35  ;;  %v3562_v32 = vld [vmem:[#allocation10 + $0x40] sm:$0xff]   ;;  %v2074_v35 = vld [vmem:[%s3840_s4] sm:$0x3] }
 0x18b   :  { %v2007_v59 = vpack.c.bf16 %v2003_v58, %v2003_v58  ;;  %v2079_v55 = vrot.slane %v2074_v35, %v368_v28  ;;  %v2083_v56 = vrot.slane %v2074_v35, %v372_v30  ;;  %v3016_v28 = vld [vmem:[%s3842_s6] ss:$0 sm:$0xff] }
 0x18d   :  { %2438 = vmatprep.mubr.bf16.mxu0 %v2007_v59 }
 0x18e   :  { %2439 = vmatmul.mubr.bf16.vlgmr.msra.gmra.mxu0 %v2006_v60 }
 0x18f   :  { %3035 = vmatpush3.bf16.msra.mxu0 %v3549_v6 }
 0x190   :  { %3036 = vmatprep.subr.bf16.mxu0 %v3550_v7 }
 0x193   :  { %3037 = vmatpush3.bf16.msra.mxu0 %v3551_v10 }
 0x194   :  { %3038 = vmatprep.subr.bf16.mxu0 %v3552_v11 }
 0x197   :  { %3039 = vmatpush3.bf16.msra.mxu0 %v3553_v12 }
 0x198   :  { %3040 = vmatprep.subr.bf16.mxu0 %v3554_v13 }
 0x19b   :  { %3041 = vmatpush3.bf16.msra.mxu0 %v3555_v14 }
 0x19c   :  { %3042 = vmatprep.subr.bf16.mxu0 %v3556_v15 }
 0x19f   :  { %3043 = vmatpush3.bf16.msra.mxu0 %v3557_v16 }
 0x1a0   :  { %3044 = vmatprep.subr.bf16.mxu0 %v3558_v17 }
 0x1a3   :  { %3045 = vmatpush3.bf16.msra.mxu0 %v3559_v47 }
 0x1a4   :  { %3046 = vmatprep.subr.bf16.mxu0 %v3560_v31 }
 0x1a7   :  { %3047 = vmatpush3.bf16.msra.mxu0 %v3561_v34 }
 0x1a8   :  { %3048 = vmatprep.subr.bf16.mxu0 %v3562_v32 }
 0x1ab   :  { %3049 = vmatpush3.bf16.msra.mxu0 %v3563_v54 }
 0x1c1   :  { %v1864_v61 = vpop.f32.mrf.mxu0 }
 0x1c2   :  { %v1905_v62 = vpop.f32.mrf.mxu1  ;;  %v1865_v25 = vadd.f32 %v1864_v61, %v377_v22 }
 0x1c3   :  { %v1866_v63 = vpop.f32.mrf.mxu0 }
 0x1c4   :  { %v1907_v0 = vpop.f32.mrf.mxu1  ;;  %v1867_v26 = vadd.f32 %v1866_v63, %v381_v24  ;;  %v1906_v27 = vadd.f32 %v1905_v62, %v1865_v25 }
 0x1c5   :  { %v1868_v1 = vpop.f32.mrf.mxu0 }
 0x1c6   :  { %v1909_v2 = vpop.f32.mrf.mxu1  ;;  %v1908_v38 = vadd.f32 %v1907_v0, %v1867_v26 }
 0x1c7   :  { %v1869_v3 = vpop.f32.mrf.mxu0 }
 0x1c8   :  { %v1910_v4 = vpop.f32.mrf.mxu1 }
 0x201   :  { %v1946_v33 = vpop.f32.mrf.mxu0 }
 0x202   :  { %v1987_v36 = vpop.f32.mrf.mxu1  ;;  %v1947_v39 = vadd.f32 %v1946_v33, %v1906_v27 }
 0x203   :  { %v1948_v49 = vpop.f32.mrf.mxu0 }
 0x204   :  { %v1989_v8 = vpop.f32.mrf.mxu1  ;;  %v1988_v9 = vadd.f32 %v1987_v36, %v1947_v39  ;;  %v1949_v52 = vadd.f32 %v1948_v49, %v1908_v38 }
 0x205   :  { %v1950_v41 = vpop.f32.mrf.mxu0 }
 0x206   :  { %v1991_v20 = vpop.f32.mrf.mxu1  ;;  %vm1996_vm2 = vcmp.gt.f32.partialorder %v1988_v9, 0.0  ;;  %v2000_v42 = vmul.f32 0.2, %v1988_v9  ;;  %v1990_v21 = vadd.f32 %v1989_v8, %v1949_v52 }
 0x207   :  { %v1951_v43 = vpop.f32.mrf.mxu0 }
 0x208   :  { %v1992_v44 = vpop.f32.mrf.mxu1  ;;  %vm1997_vm3 = vcmp.gt.f32.partialorder %v1990_v21, 0.0  ;;  %v2001_v29 = vmul.f32 0.2, %v1990_v21  ;;  %v2004_v37 = vsel %vm1996_vm2, %v1988_v9, %v2000_v42 }
 0x209   :  { %v2008_v46 = vpack.c.bf16 %v2004_v37, %v2004_v37 }
 0x20a   :  { %v2005_v40 = vsel %vm1997_vm3, %v1990_v21, %v2001_v29 }
 0x20b   :  { %v2009_v45 = vpack.c.bf16 %v2005_v40, %v2005_v40 }
 0x20d   :  { %2479 = vmatprep.mubr.bf16.mxu1 %v2009_v45 }
 0x20e   :  { %2480 = vmatmul.mubr.bf16.vlgmr.msra.gmra.mxu1 %v2008_v46 }
 0x24e   :  { %v2440_v48 = vpop.f32.mrf.mxu0 }
 0x24f   :  { %v2441_v57 = vadd.f32 %v2440_v48, %v2079_v55 }
 0x250   :  { %v2442_v50 = vpop.f32.mrf.mxu0 }
 0x251   :  { %v2443_v59 = vadd.f32 %v2442_v50, %v2083_v56 }
 0x252   :  { %v2444_v51 = vpop.f32.mrf.mxu0 }
 0x254   :  { %v2445_v53 = vpop.f32.mrf.mxu0 }
 0x2ce   :  { %v2481_v58 = vpop.f32.mrf.mxu1 }
 0x2cf   :  { %v2482_v60 = vadd.f32 %v2481_v58, %v2441_v57 }
 0x2d0   :  { %v2483_v61 = vpop.f32.mrf.mxu1 }
 0x2d1   :  { %vm2488_vm4 = vcmp.gt.f32.partialorder %v2482_v60, 0.0  ;;  %v2490_v62 = vmul.f32 0.2, %v2482_v60  ;;  %v2484_v63 = vadd.f32 %v2483_v61, %v2443_v59 }
 0x2d2   :  { %v2485_v0 = vpop.f32.mrf.mxu1 }
 0x2d3   :  { %vm2489_vm5 = vcmp.gt.f32.partialorder %v2484_v63, 0.0  ;;  %v2491_v1 = vmul.f32 0.2, %v2484_v63  ;;  %v2492_v2 = vsel %vm2488_vm4, %v2482_v60, %v2490_v62 }
 0x2d4   :  { %v2486_v3 = vpop.f32.mrf.mxu1  ;;  %v2494_v6 = vpack.c.bf16 %v2492_v2, %v2492_v2 }
 0x2d5   :  { %v2493_v4 = vsel %vm2489_vm5, %v2484_v63, %v2491_v1 }
 0x2d6   :  { %v2495_v5 = vpack.c.bf16 %v2493_v4, %v2493_v4 }
 0x2d8   :  { %2663 = vmatprep.mubr.bf16.mxu0 %v2495_v5 }
 0x2d9   :  { %2664 = vmatmul.mubr.bf16.vlgmr.msra.gmra.mxu0 %v2494_v6 }
 0x399   :  { %v3050_v23 = vpop.f32.mrf.mxu0 }
 0x39b   :  { %v3051_v30 = vpop.f32.mrf.mxu0 }
 0x39c   :  { %v3052_v7 = vadd.f32 %v3051_v30, %v3050_v23 }
 0x39d   :  { %v3053_v10 = vpop.f32.mrf.mxu0 }
 0x39e   :  { %v2666_v11 = vadd.f32 %v3052_v7, %v3016_v28 }
 0x39f   :  { %v3054_v12 = vpop.f32.mrf.mxu0 }
 0x3a0   :  { %v3033_v13 = vmul.f32 -1.442695, %v2666_v11 }
 0x3a2   :  { %3564 = vpow2.f32 %v3033_v13 }
 0x3af   :  { %v3565_v14 = vpop.eup %3564 }
 0x3b0   :  { %v2674_v15 = vadd.f32 1.0, %v3565_v14 }
 0x3b2   :  { %3566 = vrcp.f32 %v2674_v15 }
 0x3bf   :  { %v3567_v16 = vpop.eup %3566 }
 0x3c0   :  { %v2677_v17 = vpack.c.bf16 %v3567_v16, %v3567_v16 }
 0x3c2   :  { %2678 = vst [vmem:[#allocation11] sm:$0xf] %v2677_v17 }
 0x3c3   :  { %3679 = shalt.err (!%p3676_p1)
}
 0x3c4   :  { %2688 = dma.vmem_to_hbm [thread:$0]  %s2686_s8, 64, %s3843_s7, [#allocation4]  }
 0x3c5   :  { %3694 = dma.done.wait [#allocation4], 64  }
 0x3c6   :  { %3695 = vsyncadd [#allocation4], 4294967232 }
 0x3c7   :  { %2692 = vsyncpa [#allocation3], 1 }
 0x3c8   :  { %2693 = vsyncpa [#allocation6], 1 }
 0x3c9   :  { %2694 = vsyncpa [#allocation9], 1 }
 0x3ca   :  { %2695 = vsyncpa [#allocation4], 1 }

</bundles_post_ra>
